<compile_context>
chip_gen: v6e
topology: v6e:2x2x1
jax: 0.10.0
libtpu: 0.0.40
codegen_flags: <defaults>
</compile_context>

<pallas_src>
import functools

import jax
import jax.numpy as jnp
from jax.experimental import pallas as pl
from jax.experimental.pallas import tpu as pltpu


# ---------------------------------------------------------------------------
# Position-encoding weights (identical to MemN2N.compute_weights, use_bow=False)
# ---------------------------------------------------------------------------
def compute_weights(J, d):
    j = jnp.arange(J, dtype=jnp.float32)[:, None]
    k = jnp.arange(d, dtype=jnp.float32)[None, :]
    return 1.0 - (j + 1.0) / J - (k + 1.0) / d * (1.0 - 2.0 * (j + 1.0) / J)


def _round_up(x, m):
    return ((x + m - 1) // m) * m


# ---------------------------------------------------------------------------
# Pallas kernel: one program per batch tile of B_TILE rows
# ---------------------------------------------------------------------------
def _make_kernel(num_hops, mem_pos, out_pos, n_uniq, vocab_size):
    def kernel(state_ref, *refs):
        r_refs = refs[:n_uniq]                         # each (Bt, M, E), operand dtype
        ta_ref, tc_ref, wout_ref, logp_ref = refs[n_uniq:]

        state = state_ref[...].astype(jnp.float32)     # (Bt, E)  f32 accumulator
        ta = ta_ref[...][None, :, :]                   # (1, M, E), hoisted out of hops
        tc = tc_ref[...][None, :, :]

        for i in range(num_hops):
            # Lazy per-hop loads: blocks are already in VMEM, re-reading only
            # costs vld slots and keeps live ranges to a single hop (no spills).
            memory = (r_refs[mem_pos[i]][...] + ta).astype(jnp.float32)  # (Bt, M, E)
            output = (r_refs[out_pos[i]][...] + tc).astype(jnp.float32)  # (Bt, M, E)
            # attention scores, lane-major: (Bt, M)
            scores = jnp.sum(memory * state[:, None, :], axis=-1)
            # stable softmax over the M memory slots (use_ls=False), f32
            mx = jnp.max(scores, axis=-1, keepdims=True)
            ex = jnp.exp(scores - mx)
            denom = jnp.sum(ex, axis=-1, keepdims=True)
            probs = ex * pl.reciprocal(denom, approx=True)   # EUP divide
            # weighted response: (Bt, E)
            response = jnp.sum(probs[:, :, None] * output, axis=1)
            state = response + state                   # use_lw=False

        # logits = state @ out.T  (pre-transposed, lane-dense (E, V_pad)) on MXU
        w = wout_ref[...]
        logits = jnp.dot(state.astype(w.dtype), w,
                         preferred_element_type=jnp.float32)   # (Bt, V_pad) f32
        # mask padded vocab columns (f32, so -1e30 is safe), then log_softmax
        col = jax.lax.broadcasted_iota(jnp.int32, logits.shape, 1)
        logits = jnp.where(col < vocab_size, logits, -1e30)
        mx = jnp.max(logits, axis=-1, keepdims=True)
        shifted = logits - mx
        lse = jnp.log(jnp.sum(jnp.exp(shifted), axis=-1, keepdims=True))
        logp_ref[...] = shifted - lse

    return kernel


# ---------------------------------------------------------------------------
# Wrapper: gathers + position-weighted reductions (fused under jit) + pallas_call
# ---------------------------------------------------------------------------
@functools.partial(
    jax.jit,
    static_argnames=("a_idx", "c_idx", "b_idx", "o_idx", "b_tile",
                     "operand_dtype", "vmem_limit_bytes"))
def memn2n_forward(story, query, emb, TA, TC, *,
                   a_idx, c_idx, b_idx, o_idx,
                   b_tile=128, operand_dtype=jnp.bfloat16,
                   vmem_limit_bytes=None):
    """emb: tuple of distinct embedding tables; a_idx/c_idx: static index tuples
    expressing the weight tying (use_lw=False adjacent tying dedups 2*hops -> hops+1
    reduced tensors)."""
    num_hops = len(a_idx)
    Bsz, M, S_s = story.shape
    _, S_q = query.shape
    V, E = emb[o_idx].shape

    wq = compute_weights(S_q, E)                     # (S_q, E)
    ws = compute_weights(S_s, E)                     # (S_s, E)

    # --- structural dedup of tied tables (by static index; survives jit) ------
    needed = []
    for t in (*a_idx, *c_idx):
        if t not in needed:
            needed.append(t)
    pos = {t: i for i, t in enumerate(needed)}
    mem_pos = tuple(pos[t] for t in a_idx)
    out_pos = tuple(pos[t] for t in c_idx)
    n_uniq = len(needed)

    # --- hoisted gather + position-weighted sentence reduction ---------------
    def reduce_story(W):                             # -> (B, M, E)
        return jnp.einsum("bmse,se->bme", jnp.take(W, story, axis=0), ws)

    uniq = [reduce_story(emb[t]).astype(operand_dtype) for t in needed]

    # query state, also reduced outside the kernel (kept f32): (B, E)
    state0 = jnp.einsum("bse,se->be", jnp.take(emb[b_idx], query, axis=0), wq)

    # --- lane-dense, pre-transposed output projection -------------------------
    v_pad = _round_up(V, 128)
    out_w_t = jnp.pad(emb[o_idx].T, ((0, 0), (0, v_pad - V))).astype(operand_dtype)
    ta = TA.astype(operand_dtype)
    tc = TC.astype(operand_dtype)

    # --- batch tiling: big tile, no full-tensor padding ------------------------
    # Cap the tile at the sublane-rounded batch (a tile bigger than the batch is
    # wasted work); partial last blocks are allowed, garbage rows stay per-row.
    bt = min(_round_up(b_tile, 8), _round_up(Bsz, 8))
    grid = (pl.cdiv(Bsz, bt),)

    r_spec = pl.BlockSpec((bt, M, E), lambda b: (b, 0, 0))
    in_specs = [pl.BlockSpec((bt, E), lambda b: (b, 0))]          # state0
    in_specs += [r_spec] * n_uniq                                 # reduced stories
    in_specs += [
        pl.BlockSpec((M, E), lambda b: (0, 0)),                   # TA (DMA'd once)
        pl.BlockSpec((M, E), lambda b: (0, 0)),                   # TC (DMA'd once)
        pl.BlockSpec((E, v_pad), lambda b: (0, 0)),               # out.T (DMA'd once)
    ]
    out_spec = pl.BlockSpec((bt, v_pad), lambda b: (b, 0))

    logp = pl.pallas_call(
        _make_kernel(num_hops, mem_pos, out_pos, n_uniq, V),
        out_shape=jax.ShapeDtypeStruct((Bsz, v_pad), jnp.float32),
        grid=grid,
        in_specs=in_specs,
        out_specs=out_spec,
        compiler_params=pltpu.CompilerParams(
            dimension_semantics=("parallel",),
            vmem_limit_bytes=vmem_limit_bytes),
    )(state0, *uniq, ta, tc, out_w_t)

    return logp[:, :V]


# ---------------------------------------------------------------------------
# Pure-JAX reference (mirrors the PyTorch forward) for a correctness check
# ---------------------------------------------------------------------------
def memn2n_ref(story, query, emb, TA, TC, *, a_idx, c_idx, b_idx, o_idx):
    num_hops = len(a_idx)
    _, _, S_s = story.shape
    _, S_q = query.shape
    V, E = emb[o_idx].shape

    wq = compute_weights(S_q, E)
    ws = compute_weights(S_s, E)

    state = jnp.sum(emb[b_idx][query] * wq, axis=1)                # (B, E)
    for i in range(num_hops):
        memory = jnp.sum(emb[a_idx[i]][story] * ws, axis=2) + TA   # (B, M, E)
        output = jnp.sum(emb[c_idx[i]][story] * ws, axis=2) + TC   # (B, M, E)
        scores = jnp.einsum("bme,be->bm", memory, state)
        probs = jax.nn.softmax(scores, axis=-1)
        response = jnp.einsum("bm,bme->be", probs, output)
        state = response + state
    logits = state @ emb[o_idx].T
    return jax.nn.log_softmax(logits, axis=-1)


# ---------------------------------------------------------------------------
if __name__ == "__main__":
    V, E, M, S_s, S_q, Bsz, NUM_HOPS = 24, 32, 8, 8, 6, 16, 3
    PAD = 0  # vocab.stoi['<pad>']

    key = jax.random.PRNGKey(0)
    keys = jax.random.split(key, 8)

    def make_embedding(k):
        w = 0.1 * jax.random.normal(k, (V, E), dtype=jnp.float32)
        return w.at[PAD].set(0.0)  # padding_idx row zeroed

    A0 = make_embedding(keys[0])
    C0 = make_embedding(keys[1])
    C1 = make_embedding(keys[2])
    C2 = make_embedding(keys[3])
    TA = 0.1 * jax.random.normal(keys[4], (M, E), dtype=jnp.float32)
    TC = 0.1 * jax.random.normal(keys[5], (M, E), dtype=jnp.float32)

    # use_lw=False adjacent tying, expressed structurally (jit-safe dedup):
    #   A = [e0, e1, e2], C = [e1, e2, e3], B = e0, out = e3.weight
    emb = (A0, C0, C1, C2)
    a_idx, c_idx, b_idx, o_idx = (0, 1, 2), (1, 2, 3), 0, 3

    story = jax.random.randint(keys[6], (Bsz, M, S_s), 0, V, dtype=jnp.int32)
    query = jax.random.randint(keys[7], (Bsz, S_q), 0, V, dtype=jnp.int32)

    ref = memn2n_ref(story, query, emb, TA, TC,
                     a_idx=a_idx, c_idx=c_idx, b_idx=b_idx, o_idx=o_idx)

    # f32 operands (v5e setting): tight numerical check against the reference.
    out_f32 = memn2n_forward(story, query, emb, TA, TC,
                             a_idx=a_idx, c_idx=c_idx, b_idx=b_idx, o_idx=o_idx,
                             b_tile=128, operand_dtype=jnp.float32)
    jax.block_until_ready(out_f32)
    assert out_f32.shape == (Bsz, V)
    assert jnp.allclose(out_f32, ref, atol=2e-3, rtol=2e-3), (out_f32, ref)

    # bf16 DMA/MXU operands (perf default on v6e/v7x): looser check.
    out_bf16 = memn2n_forward(story, query, emb, TA, TC,
                              a_idx=a_idx, c_idx=c_idx, b_idx=b_idx, o_idx=o_idx,
                              b_tile=128, operand_dtype=jnp.bfloat16)
    jax.block_until_ready(out_bf16)
    assert out_bf16.shape == (Bsz, V)
    assert jnp.allclose(out_bf16, ref, atol=3e-2, rtol=3e-2), (out_bf16, ref)

    print("KERNEL_OK")
</pallas_src>

<mosaic_0001>
module attributes {stable_mosaic.version = 11 : i64} {
  func.func @kernel(%arg0: i32, %arg1: memref<16x32xf32, #tpu.memory_space<vmem>>, %arg2: memref<16x8x32xf32, #tpu.memory_space<vmem>>, %arg3: memref<16x8x32xf32, #tpu.memory_space<vmem>>, %arg4: memref<16x8x32xf32, #tpu.memory_space<vmem>>, %arg5: memref<16x8x32xf32, #tpu.memory_space<vmem>>, %arg6: memref<8x32xf32, #tpu.memory_space<vmem>>, %arg7: memref<8x32xf32, #tpu.memory_space<vmem>>, %arg8: memref<32x128xf32, #tpu.memory_space<vmem>>, %arg9: memref<16x128xf32, #tpu.memory_space<vmem>>) attributes {dimension_semantics = [#tpu.dimension_semantics<parallel>], iteration_bounds = array<i64: 1>, scalar_prefetch = 0 : i64, scratch_operands = 0 : i64, tpu.core_type = #tpu.core_type<tc>, window_params = [{transform_indices = @transform_0, window_bounds = array<i64: 16, 32>}, {transform_indices = @transform_1, window_bounds = array<i64: 16, 8, 32>}, {transform_indices = @transform_2, window_bounds = array<i64: 16, 8, 32>}, {transform_indices = @transform_3, window_bounds = array<i64: 16, 8, 32>}, {transform_indices = @transform_4, window_bounds = array<i64: 16, 8, 32>}, {pipeline_mode = #tpu.pipeline_mode<synchronous>, transform_indices = @transform_5, window_bounds = array<i64: 8, 32>}, {pipeline_mode = #tpu.pipeline_mode<synchronous>, transform_indices = @transform_6, window_bounds = array<i64: 8, 32>}, {pipeline_mode = #tpu.pipeline_mode<synchronous>, transform_indices = @transform_7, window_bounds = array<i64: 32, 128>}, {transform_indices = @transform_8, window_bounds = array<i64: 16, 128>}]} {
    %c0 = arith.constant 0 : index
    %c0_0 = arith.constant 0 : index
    %0 = vector.load %arg1[%c0, %c0_0] : memref<16x32xf32, #tpu.memory_space<vmem>>, vector<16x32xf32>
    %c0_1 = arith.constant 0 : index
    %c0_2 = arith.constant 0 : index
    %1 = vector.load %arg6[%c0_1, %c0_2] : memref<8x32xf32, #tpu.memory_space<vmem>>, vector<8x32xf32>
    %2 = vector.shape_cast %1 : vector<8x32xf32> to vector<1x8x32xf32>
    %c0_3 = arith.constant 0 : index
    %c0_4 = arith.constant 0 : index
    %3 = vector.load %arg7[%c0_3, %c0_4] : memref<8x32xf32, #tpu.memory_space<vmem>>, vector<8x32xf32>
    %4 = vector.shape_cast %3 : vector<8x32xf32> to vector<1x8x32xf32>
    %c0_5 = arith.constant 0 : index
    %c0_6 = arith.constant 0 : index
    %c0_7 = arith.constant 0 : index
    %5 = vector.load %arg2[%c0_5, %c0_6, %c0_7] : memref<16x8x32xf32, #tpu.memory_space<vmem>>, vector<16x8x32xf32>
    %6 = vector.broadcast %2 : vector<1x8x32xf32> to vector<16x8x32xf32>
    %7 = arith.addf %5, %6 : vector<16x8x32xf32>
    %c0_8 = arith.constant 0 : index
    %c0_9 = arith.constant 0 : index
    %c0_10 = arith.constant 0 : index
    %8 = vector.load %arg3[%c0_8, %c0_9, %c0_10] : memref<16x8x32xf32, #tpu.memory_space<vmem>>, vector<16x8x32xf32>
    %9 = vector.broadcast %4 : vector<1x8x32xf32> to vector<16x8x32xf32>
    %10 = arith.addf %8, %9 : vector<16x8x32xf32>
    %11 = vector.shape_cast %0 : vector<16x32xf32> to vector<16x1x32xf32>
    %12 = vector.broadcast %11 : vector<16x1x32xf32> to vector<16x8x32xf32>
    %13 = arith.mulf %7, %12 : vector<16x8x32xf32>
    %cst = arith.constant dense<0.000000e+00> : vector<16x8xf32>
    %14 = vector.multi_reduction <add>, %13, %cst [2] : vector<16x8x32xf32> to vector<16x8xf32>
    %cst_11 = arith.constant dense<0xFF800000> : vector<16xf32>
    %15 = vector.multi_reduction <maximumf>, %14, %cst_11 [1] : vector<16x8xf32> to vector<16xf32>
    %16 = vector.shape_cast %15 : vector<16xf32> to vector<16x1xf32>
    %17 = vector.broadcast %16 : vector<16x1xf32> to vector<16x8xf32>
    %18 = arith.subf %14, %17 : vector<16x8xf32>
    %19 = math.exp %18 : vector<16x8xf32>
    %cst_12 = arith.constant dense<0.000000e+00> : vector<16xf32>
    %20 = vector.multi_reduction <add>, %19, %cst_12 [1] : vector<16x8xf32> to vector<16xf32>
    %21 = vector.shape_cast %20 : vector<16xf32> to vector<16x1xf32>
    %22 = tpu.reciprocal %21 {approx = true} : vector<16x1xf32> -> vector<16x1xf32>
    %23 = vector.broadcast %22 : vector<16x1xf32> to vector<16x8xf32>
    %24 = arith.mulf %19, %23 : vector<16x8xf32>
    %25 = vector.shape_cast %24 : vector<16x8xf32> to vector<16x8x1xf32>
    %26 = vector.broadcast %25 : vector<16x8x1xf32> to vector<16x8x32xf32>
    %27 = arith.mulf %26, %10 : vector<16x8x32xf32>
    %cst_13 = arith.constant dense<0.000000e+00> : vector<16x32xf32>
    %28 = vector.multi_reduction <add>, %27, %cst_13 [1] : vector<16x8x32xf32> to vector<16x32xf32>
    %29 = arith.addf %28, %0 : vector<16x32xf32>
    %c0_14 = arith.constant 0 : index
    %c0_15 = arith.constant 0 : index
    %c0_16 = arith.constant 0 : index
    %30 = vector.load %arg3[%c0_14, %c0_15, %c0_16] : memref<16x8x32xf32, #tpu.memory_space<vmem>>, vector<16x8x32xf32>
    %31 = vector.broadcast %2 : vector<1x8x32xf32> to vector<16x8x32xf32>
    %32 = arith.addf %30, %31 : vector<16x8x32xf32>
    %c0_17 = arith.constant 0 : index
    %c0_18 = arith.constant 0 : index
    %c0_19 = arith.constant 0 : index
    %33 = vector.load %arg4[%c0_17, %c0_18, %c0_19] : memref<16x8x32xf32, #tpu.memory_space<vmem>>, vector<16x8x32xf32>
    %34 = vector.broadcast %4 : vector<1x8x32xf32> to vector<16x8x32xf32>
    %35 = arith.addf %33, %34 : vector<16x8x32xf32>
    %36 = vector.shape_cast %29 : vector<16x32xf32> to vector<16x1x32xf32>
    %37 = vector.broadcast %36 : vector<16x1x32xf32> to vector<16x8x32xf32>
    %38 = arith.mulf %32, %37 : vector<16x8x32xf32>
    %cst_20 = arith.constant dense<0.000000e+00> : vector<16x8xf32>
    %39 = vector.multi_reduction <add>, %38, %cst_20 [2] : vector<16x8x32xf32> to vector<16x8xf32>
    %cst_21 = arith.constant dense<0xFF800000> : vector<16xf32>
    %40 = vector.multi_reduction <maximumf>, %39, %cst_21 [1] : vector<16x8xf32> to vector<16xf32>
    %41 = vector.shape_cast %40 : vector<16xf32> to vector<16x1xf32>
    %42 = vector.broadcast %41 : vector<16x1xf32> to vector<16x8xf32>
    %43 = arith.subf %39, %42 : vector<16x8xf32>
    %44 = math.exp %43 : vector<16x8xf32>
    %cst_22 = arith.constant dense<0.000000e+00> : vector<16xf32>
    %45 = vector.multi_reduction <add>, %44, %cst_22 [1] : vector<16x8xf32> to vector<16xf32>
    %46 = vector.shape_cast %45 : vector<16xf32> to vector<16x1xf32>
    %47 = tpu.reciprocal %46 {approx = true} : vector<16x1xf32> -> vector<16x1xf32>
    %48 = vector.broadcast %47 : vector<16x1xf32> to vector<16x8xf32>
    %49 = arith.mulf %44, %48 : vector<16x8xf32>
    %50 = vector.shape_cast %49 : vector<16x8xf32> to vector<16x8x1xf32>
    %51 = vector.broadcast %50 : vector<16x8x1xf32> to vector<16x8x32xf32>
    %52 = arith.mulf %51, %35 : vector<16x8x32xf32>
    %cst_23 = arith.constant dense<0.000000e+00> : vector<16x32xf32>
    %53 = vector.multi_reduction <add>, %52, %cst_23 [1] : vector<16x8x32xf32> to vector<16x32xf32>
    %54 = arith.addf %53, %29 : vector<16x32xf32>
    %c0_24 = arith.constant 0 : index
    %c0_25 = arith.constant 0 : index
    %c0_26 = arith.constant 0 : index
    %55 = vector.load %arg4[%c0_24, %c0_25, %c0_26] : memref<16x8x32xf32, #tpu.memory_space<vmem>>, vector<16x8x32xf32>
    %56 = vector.broadcast %2 : vector<1x8x32xf32> to vector<16x8x32xf32>
    %57 = arith.addf %55, %56 : vector<16x8x32xf32>
    %c0_27 = arith.constant 0 : index
    %c0_28 = arith.constant 0 : index
    %c0_29 = arith.constant 0 : index
    %58 = vector.load %arg5[%c0_27, %c0_28, %c0_29] : memref<16x8x32xf32, #tpu.memory_space<vmem>>, vector<16x8x32xf32>
    %59 = vector.broadcast %4 : vector<1x8x32xf32> to vector<16x8x32xf32>
    %60 = arith.addf %58, %59 : vector<16x8x32xf32>
    %61 = vector.shape_cast %54 : vector<16x32xf32> to vector<16x1x32xf32>
    %62 = vector.broadcast %61 : vector<16x1x32xf32> to vector<16x8x32xf32>
    %63 = arith.mulf %57, %62 : vector<16x8x32xf32>
    %cst_30 = arith.constant dense<0.000000e+00> : vector<16x8xf32>
    %64 = vector.multi_reduction <add>, %63, %cst_30 [2] : vector<16x8x32xf32> to vector<16x8xf32>
    %cst_31 = arith.constant dense<0xFF800000> : vector<16xf32>
    %65 = vector.multi_reduction <maximumf>, %64, %cst_31 [1] : vector<16x8xf32> to vector<16xf32>
    %66 = vector.shape_cast %65 : vector<16xf32> to vector<16x1xf32>
    %67 = vector.broadcast %66 : vector<16x1xf32> to vector<16x8xf32>
    %68 = arith.subf %64, %67 : vector<16x8xf32>
    %69 = math.exp %68 : vector<16x8xf32>
    %cst_32 = arith.constant dense<0.000000e+00> : vector<16xf32>
    %70 = vector.multi_reduction <add>, %69, %cst_32 [1] : vector<16x8xf32> to vector<16xf32>
    %71 = vector.shape_cast %70 : vector<16xf32> to vector<16x1xf32>
    %72 = tpu.reciprocal %71 {approx = true} : vector<16x1xf32> -> vector<16x1xf32>
    %73 = vector.broadcast %72 : vector<16x1xf32> to vector<16x8xf32>
    %74 = arith.mulf %69, %73 : vector<16x8xf32>
    %75 = vector.shape_cast %74 : vector<16x8xf32> to vector<16x8x1xf32>
    %76 = vector.broadcast %75 : vector<16x8x1xf32> to vector<16x8x32xf32>
    %77 = arith.mulf %76, %60 : vector<16x8x32xf32>
    %cst_33 = arith.constant dense<0.000000e+00> : vector<16x32xf32>
    %78 = vector.multi_reduction <add>, %77, %cst_33 [1] : vector<16x8x32xf32> to vector<16x32xf32>
    %79 = arith.addf %78, %54 : vector<16x32xf32>
    %c0_34 = arith.constant 0 : index
    %c0_35 = arith.constant 0 : index
    %80 = vector.load %arg8[%c0_34, %c0_35] : memref<32x128xf32, #tpu.memory_space<vmem>>, vector<32x128xf32>
    %cst_36 = arith.constant dense<0.000000e+00> : vector<16x128xf32>
    %81 = tpu.matmul %79, %80, %cst_36 {dimension_numbers = #tpu.dot_dimension_numbers<[1], [0], [0], [1], [0, 0, 1, 1], [], []>} : vector<16x32xf32>, vector<32x128xf32>, vector<16x128xf32> -> vector<16x128xf32>
    %82 = tpu.iota {dimensions = array<i32: 1>} : vector<16x128xi32>
    %c24_i32 = arith.constant 24 : i32
    %83 = vector.broadcast %c24_i32 : i32 to vector<16x128xi32>
    %84 = arith.cmpi slt, %82, %83 : vector<16x128xi32>
    %cst_37 = arith.constant -1.000000e+30 : f32
    %85 = vector.broadcast %cst_37 : f32 to vector<16x128xf32>
    %86 = arith.select %84, %81, %85 : vector<16x128xi1>, vector<16x128xf32>
    %cst_38 = arith.constant dense<0xFF800000> : vector<16xf32>
    %87 = vector.multi_reduction <maximumf>, %86, %cst_38 [1] : vector<16x128xf32> to vector<16xf32>
    %88 = vector.shape_cast %87 : vector<16xf32> to vector<16x1xf32>
    %89 = vector.broadcast %88 : vector<16x1xf32> to vector<16x128xf32>
    %90 = arith.subf %86, %89 : vector<16x128xf32>
    %91 = math.exp %90 : vector<16x128xf32>
    %cst_39 = arith.constant dense<0.000000e+00> : vector<16xf32>
    %92 = vector.multi_reduction <add>, %91, %cst_39 [1] : vector<16x128xf32> to vector<16xf32>
    %93 = vector.shape_cast %92 : vector<16xf32> to vector<16x1xf32>
    %94 = math.log %93 : vector<16x1xf32>
    %95 = vector.broadcast %94 : vector<16x1xf32> to vector<16x128xf32>
    %96 = arith.subf %90, %95 : vector<16x128xf32>
    %c0_40 = arith.constant 0 : index
    %c0_41 = arith.constant 0 : index
    %97 = vector.load %arg9[%c0_40, %c0_41] : memref<16x128xf32, #tpu.memory_space<vmem>>, vector<16x128xf32>
    tpu.vector_store %arg9[%c0_40, %c0_41], %96 {strides = array<i32>} : memref<16x128xf32, #tpu.memory_space<vmem>>, vector<16x128xf32>,
    return
  }
  func.func @transform_0(%arg0: i32) -> (i32, i32) {
    %c0_i32 = arith.constant 0 : i32
    %c0_i32_0 = arith.constant 0 : i32
    return %arg0, %c0_i32 : i32, i32
  }
  func.func @transform_1(%arg0: i32) -> (i32, i32, i32) {
    %c0_i32 = arith.constant 0 : i32
    %c0_i32_0 = arith.constant 0 : i32
    %c0_i32_1 = arith.constant 0 : i32
    return %arg0, %c0_i32, %c0_i32_0 : i32, i32, i32
  }
  func.func @transform_2(%arg0: i32) -> (i32, i32, i32) {
    %c0_i32 = arith.constant 0 : i32
    %c0_i32_0 = arith.constant 0 : i32
    %c0_i32_1 = arith.constant 0 : i32
    return %arg0, %c0_i32, %c0_i32_0 : i32, i32, i32
  }
  func.func @transform_3(%arg0: i32) -> (i32, i32, i32) {
    %c0_i32 = arith.constant 0 : i32
    %c0_i32_0 = arith.constant 0 : i32
    %c0_i32_1 = arith.constant 0 : i32
    return %arg0, %c0_i32, %c0_i32_0 : i32, i32, i32
  }
  func.func @transform_4(%arg0: i32) -> (i32, i32, i32) {
    %c0_i32 = arith.constant 0 : i32
    %c0_i32_0 = arith.constant 0 : i32
    %c0_i32_1 = arith.constant 0 : i32
    return %arg0, %c0_i32, %c0_i32_0 : i32, i32, i32
  }
  func.func @transform_5(%arg0: i32) -> (i32, i32) {
    %c0_i32 = arith.constant 0 : i32
    %c0_i32_0 = arith.constant 0 : i32
    %c0_i32_1 = arith.constant 0 : i32
    return %c0_i32, %c0_i32_0 : i32, i32
  }
  func.func @transform_6(%arg0: i32) -> (i32, i32) {
    %c0_i32 = arith.constant 0 : i32
    %c0_i32_0 = arith.constant 0 : i32
    %c0_i32_1 = arith.constant 0 : i32
    return %c0_i32, %c0_i32_0 : i32, i32
  }
  func.func @transform_7(%arg0: i32) -> (i32, i32) {
    %c0_i32 = arith.constant 0 : i32
    %c0_i32_0 = arith.constant 0 : i32
    %c0_i32_1 = arith.constant 0 : i32
    return %c0_i32, %c0_i32_0 : i32, i32
  }
  func.func @transform_8(%arg0: i32) -> (i32, i32) {
    %c0_i32 = arith.constant 0 : i32
    %c0_i32_0 = arith.constant 0 : i32
    return %arg0, %c0_i32 : i32, i32
  }
}

</mosaic_0001>

<bundles_post_ra>
// kernel: memn2n_forward.1
= control target key start
LH: loop header
LB: loop body
LE: loop exit
PB: predicated region body
PF: predicated region fallthrough
CT: control target
= control target key end

     0   :  { %v104_v0 = vlaneseq  ;;  %v3193_v1 = vmov 1966171168   ;;  %vm294_vm0 = vcmask 261120   ;;  %s4859_s0 = inlined_call_operand.vmem [shape: f32[16,32], index: 0, kind: input, shape index: {}]   ;;  %s4860_s1 = inlined_call_operand.vmem [shape: f32[16,8,32], index: 1, kind: input, shape index: {}]   ;;  %s4861_s2 = inlined_call_operand.vmem [shape: f32[16,8,32], index: 2, kind: input, shape index: {}]   ;;  %s4862_s3 = inlined_call_operand.vmem [shape: f32[16,8,32], index: 3, kind: input, shape index: {}]   ;;  %s4863_s4 = inlined_call_operand.vmem [shape: f32[16,8,32], index: 4, kind: input, shape index: {}]   ;;  %s4864_s5 = inlined_call_operand.vmem [shape: f32[8,32], index: 5, kind: input, shape index: {}]   ;;  %s4865_s6 = inlined_call_operand.vmem [shape: f32[8,32], index: 6, kind: input, shape index: {}]   ;;  %s4866_s7 = inlined_call_operand.vmem [shape: f32[32,128], index: 7, kind: input, shape index: {}]   ;;  %s4867_s8 = inlined_call_operand.hbm [shape: f32[16,128], index: 8, kind: output, shape index: {}]  }
   0x1   :  { %v102_v2 = vunpack.c.l.s4 %v3193_v1  ;;  %v3246_v3 = vld [vmem:[%s4859_s0 + $0x8] sm:$0xff]  ;;  %v3254_v5 = vld [vmem:[%s4859_s0] sm:$0xff] }
   0x2   :  { %v3249_v4 = vshrl.u32 %v104_v0, 7  ;;  %v3259_v6 = vld [vmem:[%s4864_s5] sm:$0xff]  ;;  %v149_v9 = vcombine.high %v3246_v3, %v3246_v3  ;;  %v100_v10 = vcombine.high %v3254_v5, %v3254_v5  ;;  %v35_v15 = vld [vmem:[%s4860_s1 + $0x8] sm:$0xff] }
   0x3   :  { %v42_v7 = vld [vmem:[%s4860_s1 + $0x40] sm:$0xff]  ;;  %v103_v8 = vunpack.c.0.s8 %v102_v2 }
   0x4   :  { %v34_v11 = vld [vmem:[%s4860_s1] sm:$0xff]  ;;  %v58_v16 = vadd.f32 %v42_v7, %v3259_v6  ;;  %v3285_v17 = vsub.s32 0, %v3249_v4 }
   0x5   :  { %v3272_v12 = vsub.s32 %v103_v8, %v3249_v4  ;;  %v46_v13 = vld [vmem:[%s4860_s1 + $0x60] sm:$0xff] }
   0x6   :  { %v38_v14 = vld [vmem:[%s4860_s1 + $0x20] sm:$0xff] }
   0x7   :  { %13 = vsyncpa [#allocation3], 0  ;;  %v156_v18 = vrot.slane %v3246_v3, %v3272_v12  ;;  %v107_v19 = vrot.slane %v3254_v5, %v3272_v12  ;;  %v3292_v20 = vrot.slane %v149_v9, %v3272_v12  ;;  %v114_v21 = vrot.slane %v100_v10, %v3272_v12  ;;  %v36_v22 = vld [vmem:[%s4860_s1 + $0x10] sm:$0xff]  ;;  %v43_v41 = vld [vmem:[%s4860_s1 + $0x48] sm:$0xff] }
   0x8   :  { %v50_v23 = vadd.f32 %v34_v11, %v3259_v6  ;;  %v62_v24 = vadd.f32 %v46_v13, %v3259_v6  ;;  %v54_v25 = vadd.f32 %v38_v14, %v3259_v6  ;;  %v51_v26 = vadd.f32 %v35_v15, %v3259_v6  ;;  %v39_v43 = vld [vmem:[%s4860_s1 + $0x28] sm:$0xff]  ;;  %v44_v59 = vld [vmem:[%s4860_s1 + $0x50] sm:$0xff]  ;;  %v45_v13 = vld [vmem:[%s4860_s1 + $0x58] sm:$0xff] }
   0x9   :  { %v172_v27 = vrot.slane %v156_v18, %v3272_v12  ;;  %v123_v28 = vrot.slane %v107_v19, %v3272_v12  ;;  %v3306_v29 = vrot.slane %v3292_v20, %v3272_v12  ;;  %v130_v30 = vrot.slane %v114_v21, %v3272_v12  ;;  %v40_v60 = vld [vmem:[%s4860_s1 + $0x30] sm:$0xff] }
   0xa   :  { %v115_v31 = vcombine.high %v107_v19, %v107_v19  ;;  %v52_v32 = vadd.f32 %v36_v22, %v3259_v6  ;;  %v164_v33 = vcombine.high %v156_v18, %v156_v18  ;;  %v116_v34 = vcombine.high %v114_v21, %v114_v21 }
   0xb   :  { %v233_v35 = vrot.slane %v172_v27, %v3285_v17  ;;  %v201_v36 = vrot.slane %v123_v28, %v3285_v17  ;;  %v249_v37 = vrot.slane %v3306_v29, %v3285_v17  ;;  %v217_v38 = vrot.slane %v130_v30, %v3285_v17 }
   0xc   :  { %v137_v39 = vrot.slane %v115_v31, %v3272_v12  ;;  %v145_v40 = vcombine.high %v123_v28, %v123_v28  ;;  %v186_v42 = vrot.slane %v164_v33, %v3272_v12  ;;  %v3324_v44 = vrot.slane %v116_v34, %v3272_v12  ;;  %v41_v28 = vld [vmem:[%s4860_s1 + $0x38] sm:$0xff] }
   0xd   :  { %v286_v45 = vmul.f32 %v233_v35, %v58_v16  ;;  %v278_v46 = vmul.f32 %v201_v36, %v50_v23  ;;  %v290_v47 = vmul.f32 %v249_v37, %v62_v24  ;;  %v282_v48 = vmul.f32 %v217_v38, %v54_v25 }
   0xe   :  { %v205_v49 = vrot.slane %v137_v39, %v3285_v17  ;;  %v209_v50 = vrot.slane %v145_v40, %v3285_v17  ;;  %v59_v53 = vadd.f32 %v43_v41, %v3259_v6  ;;  %v55_v54 = vadd.f32 %v39_v43, %v3259_v6  ;;  %v49_v43 = vld [vmem:[%s4860_s1 + $0x78] sm:$0xff] }
   0xf   :  { %v319_v51 = vsel %vm294_vm0, %v286_v45, 0.0  ;;  %v295_v52 = vsel %vm294_vm0, %v278_v46, 0.0  ;;  %v331_v55 = vsel %vm294_vm0, %v290_v47, 0.0  ;;  %v307_v56 = vsel %vm294_vm0, %v282_v48, 0.0 }
  0x10   :  { %320 = vadd.xlane.f32.xlu1 %v319_v51  ;;  %296 = vadd.xlane.f32.xlu0 %v295_v52  ;;  %v237_v57 = vrot.slane %v186_v42, %v3285_v17  ;;  %v221_v58 = vrot.slane %v3324_v44, %v3285_v17  ;;  %v279_v61 = vmul.f32 %v205_v49, %v51_v26  ;;  %v47_v26 = vld [vmem:[%s4860_s1 + $0x68] sm:$0xff]  ;;  %vm425_vm1 = vcmask 1041409  }
  0x11   :  { %v280_v62 = vmul.f32 %v209_v50, %v52_v32  ;;  %v194_v63 = vcombine.high %v172_v27, %v172_v27  ;;  %v146_v1 = vcombine.high %v130_v30, %v130_v30  ;;  %v60_v2 = vadd.f32 %v44_v59, %v3259_v6 }
  0x12   :  { %v56_v7 = vadd.f32 %v40_v60, %v3259_v6  ;;  %v196_v8 = vcombine.high %v186_v42, %v186_v42  ;;  %v165_v9 = vcombine.high %v3292_v20, %v3292_v20  ;;  %v287_v10 = vmul.f32 %v237_v57, %v59_v53  ;;  %v37_v20 = vld [vmem:[%s4860_s1 + $0x18] sm:$0xff]  ;;  %v48_v42 = vld [vmem:[%s4860_s1 + $0x70] sm:$0xff] }
  0x13   :  { %v283_v11 = vmul.f32 %v221_v58, %v55_v54  ;;  %v147_v14 = vcombine.high %v137_v39, %v137_v39  ;;  %v298_v15 = vsel %vm294_vm0, %v279_v61, 0.0  ;;  %v301_v16 = vsel %vm294_vm0, %v280_v62, 0.0 }
  0x14   :  { %332 = vadd.xlane.f32.xlu0 %v331_v55  ;;  %308 = vadd.xlane.f32.xlu1 %v307_v56  ;;  %v241_v18 = vrot.slane %v194_v63, %v3285_v17  ;;  %v225_v19 = vrot.slane %v146_v1, %v3285_v17  ;;  %v61_v21 = vadd.f32 %v45_v13, %v3259_v6  ;;  %v322_v23 = vsel %vm294_vm0, %v287_v10, 0.0 }
  0x15   :  { %v245_v22 = vrot.slane %v196_v8, %v3285_v17  ;;  %v53_v24 = vadd.f32 %v37_v20, %v3259_v6  ;;  %v213_v25 = vrot.slane %v147_v14, %v3285_v17  ;;  %v193_v27 = vrot.slane %v165_v9, %v3272_v12 }
  0x16   :  { %v310_v30 = vsel %vm294_vm0, %v283_v11, 0.0  ;;  %v288_v31 = vmul.f32 %v241_v18, %v60_v2  ;;  %v284_v32 = vmul.f32 %v225_v19, %v56_v7  ;;  %v148_v33 = vcombine.high %v3324_v44, %v3324_v44 }
  0x17   :  { %v289_v34 = vmul.f32 %v245_v22, %v61_v21  ;;  %v63_v35 = vadd.f32 %v47_v26, %v3259_v6  ;;  %v57_v36 = vadd.f32 %v41_v28, %v3259_v6  ;;  %v281_v37 = vmul.f32 %v213_v25, %v53_v24 }
  0x18   :  { %299 = vadd.xlane.f32.xlu0 %v298_v15  ;;  %302 = vadd.xlane.f32.xlu1 %v301_v16  ;;  %v253_v12 = vrot.slane %v193_v27, %v3285_v17  ;;  %v195_v38 = vcombine.high %v3306_v29, %v3306_v29  ;;  %v325_v39 = vsel %vm294_vm0, %v288_v31, 0.0  ;;  %v313_v40 = vsel %vm294_vm0, %v284_v32, 0.0 }
  0x19   :  { %v229_v41 = vrot.slane %v148_v33, %v3285_v17  ;;  %v197_v44 = vcombine.high %v193_v27, %v193_v27  ;;  %v328_v45 = vsel %vm294_vm0, %v289_v34, 0.0  ;;  %v64_v29 = vadd.f32 %v48_v42, %v3259_v6 }
  0x1a   :  { %v257_v46 = vrot.slane %v195_v38, %v3285_v17  ;;  %v65_v47 = vadd.f32 %v49_v43, %v3259_v6  ;;  %v304_v48 = vsel %vm294_vm0, %v281_v37, 0.0  ;;  %v291_v49 = vmul.f32 %v253_v12, %v63_v35 }
  0x1b   :  { %v285_v50 = vmul.f32 %v229_v41, %v57_v36  ;;  %v261_v51 = vrot.slane %v197_v44, %v3285_v17  ;;  %v3409_v1 = vand.u32 127, %v104_v0  ;;  %vm427_vm2 = vcmask 1042434  }
  0x1c   :  { %323 = vadd.xlane.f32.xlu0 %v322_v23  ;;  %311 = vadd.xlane.f32.xlu1 %v310_v30  ;;  %v334_v52 = vsel %vm294_vm0, %v291_v49, 0.0  ;;  %v292_v54 = vmul.f32 %v257_v46, %v64_v29  ;;  %vm429_vm3 = vcmask 1043459   ;;  %vm431_vm4 = vcmask 1044484  }
  0x1d   :  { %v316_v53 = vsel %vm294_vm0, %v285_v50, 0.0  ;;  %v293_v55 = vmul.f32 %v261_v51, %v65_v47  ;;  %4892 = vst [vmem:[#allocation5_spill] sm:$0xff] %v3409_v1  ;;  %v3417_v8 = vsub.s32 %v3409_v1, %v3249_v4  ;;  %vm433_vm5 = vcmask 1045509  }
  0x1e   :  { %v337_v56 = vsel %vm294_vm0, %v292_v54, 0.0  ;;  %vm435_vm6 = vcmask 1046534   ;;  %vm437_vm7 = vcmask 1047559   ;;  %vm448_vm8 = vcmask 64512  }
  0x1f   :  { %v340_v57 = vsel %vm294_vm0, %v293_v55, 0.0  ;;  %4893 = vst [vmem:[#allocation6_spill] sm:$0xff] %v3417_v8  ;;  %v3194_v49 = vmov 0   ;;  %v3478_v50 = vsub.s32 1, %v3249_v4  ;;  %v3481_v51 = vsub.s32 2, %v3249_v4 }
  0x20   :  { %326 = vadd.xlane.f32.xlu0 %v325_v39  ;;  %314 = vadd.xlane.f32.xlu1 %v313_v40 }
  0x21   :  { %3046 = vset.pattern.permute.xlu1 %v3194_v49  ;;  %3045 = vset.pattern.permute.xlu0 %v3194_v49  ;;  %4894 = vst [vmem:[#allocation7_spill] sm:$0xff] %v3478_v50  ;;  %4895 = vst [vmem:[#allocation8_spill] sm:$0xff] %v3481_v51 }
  0x24   :  { %329 = vadd.xlane.f32.xlu0 %v328_v45  ;;  %305 = vadd.xlane.f32.xlu1 %v304_v48 }
  0x28   :  { %335 = vadd.xlane.f32.xlu0 %v334_v52  ;;  %317 = vadd.xlane.f32.xlu1 %v316_v53  ;;  %v3484_v52 = vsub.s32 5, %v3249_v4  ;;  %v3487_v53 = vsub.s32 6, %v3249_v4 }
  0x2a   :  { %4896 = vst [vmem:[#allocation9_spill] sm:$0xff] %v3484_v52  ;;  %4897 = vst [vmem:[#allocation10_spill] sm:$0xff] %v3487_v53 }
  0x2c   :  { %338 = vadd.xlane.f32.xlu0 %v337_v56  ;;  %341 = vadd.xlane.f32.xlu1 %v340_v57 }
  0x99   :  { %v3396_v58 = vpop.xlane.xlu1 %320  ;;  %v3398_v59 = vpop.xlane.xlu0 %296 }
  0x9a   :  { %v364_v0 = vrot.slane %v3398_v59, %v3417_v8  ;;  %v396_v21 = vrot.slane %v3396_v58, %v3417_v8 }
  0x9d   :  { %v3400_v60 = vpop.xlane.xlu0 %332  ;;  %v3402_v61 = vpop.xlane.xlu1 %308 }
  0x9e   :  { %v380_v22 = vrot.slane %v3402_v61, %v3417_v8  ;;  %v412_v38 = vrot.slane %v3400_v60, %v3417_v8 }
  0xa1   :  { %v3404_v62 = vpop.xlane.xlu0 %299  ;;  %v3406_v63 = vpop.xlane.xlu1 %302 }
  0xa2   :  { %v368_v9 = vrot.slane %v3404_v62, %v3417_v8  ;;  %v372_v13 = vrot.slane %v3406_v63, %v3417_v8 }
  0xa4   :  { %v426_v14 = vsel %vm425_vm1, %v368_v9, %v364_v0  ;;  %v3493_v9 = vsub.s32 7, %v3249_v4 }
  0xa5   :  { %v3411_v2 = vpop.xlane.xlu0 %323  ;;  %v3413_v7 = vpop.xlane.xlu1 %311  ;;  %v428_v23 = vsel %vm427_vm2, %v372_v13, %v426_v14 }
  0xa6   :  { %v400_v15 = vrot.slane %v3411_v2, %v3417_v8  ;;  %v384_v25 = vrot.slane %v3413_v7, %v3417_v8  ;;  %4898 = vst [vmem:[#allocation11_spill] sm:$0xff] %v3493_v9 }
  0xa8   :  { %v439_v27 = vsel %vm425_vm1, %v400_v15, %v396_v21 }
  0xa9   :  { %v3421_v10 = vpop.xlane.xlu0 %326  ;;  %v3423_v11 = vpop.xlane.xlu1 %314 }
  0xaa   :  { %v404_v19 = vrot.slane %v3421_v10, %v3417_v8  ;;  %v388_v28 = vrot.slane %v3423_v11, %v3417_v8 }
  0xac   :  { %v440_v33 = vsel %vm427_vm2, %v404_v19, %v439_v27 }
  0xad   :  { %v3432_v16 = vpop.xlane.xlu0 %329  ;;  %v3434_v18 = vpop.xlane.xlu1 %305 }
  0xae   :  { %v376_v20 = vrot.slane %v3434_v18, %v3417_v8  ;;  %v408_v24 = vrot.slane %v3432_v16, %v3417_v8 }
  0xb0   :  { %v430_v26 = vsel %vm429_vm3, %v376_v20, %v428_v23  ;;  %v441_v36 = vsel %vm429_vm3, %v408_v24, %v440_v33  ;;  %v3504_v24 = vsub.s32 3, %v3249_v4 }
  0xb1   :  { %v3453_v30 = vpop.xlane.xlu0 %335  ;;  %v318_v31 = vpop.xlane.xlu1 %317  ;;  %v432_v32 = vsel %vm431_vm4, %v380_v22, %v430_v26  ;;  %v442_v45 = vsel %vm431_vm4, %v412_v38, %v441_v36  ;;  %v3518_v36 = vsub.s32 4, %v3249_v4 }
  0xb2   :  { %v392_v34 = vrot.slane %v318_v31, %v3417_v8  ;;  %v434_v35 = vsel %vm433_vm5, %v384_v25, %v432_v32  ;;  %v416_v37 = vrot.slane %v3453_v30, %v3417_v8  ;;  %4899 = vst [vmem:[#allocation12_spill] sm:$0xff] %v3504_v24 }
  0xb3   :  { %v436_v12 = vsel %vm435_vm6, %v388_v28, %v434_v35  ;;  %4900 = vst [vmem:[#allocation13_spill] sm:$0xff] %v3518_v36 }
  0xb4   :  { %v438_v39 = vsel %vm437_vm7, %v392_v34, %v436_v12  ;;  %v443_v29 = vsel %vm433_vm5, %v416_v37, %v442_v45 }
  0xb5   :  { %v3466_v40 = vpop.xlane.xlu0 %338  ;;  %v449_v41 = vsel %vm448_vm8, %v438_v39, -inf  ;;  %v342_v42 = vpop.xlane.xlu1 %341 }
  0xb6   :  { %v420_v43 = vrot.slane %v3466_v40, %v3417_v8  ;;  %450 = vmax.xlane.f32.xlu0 %v449_v41  ;;  %v424_v44 = vrot.slane %v342_v42, %v3417_v8 }
  0xb8   :  { %v444_v46 = vsel %vm435_vm6, %v420_v43, %v443_v29 }
  0xb9   :  { %v445_v47 = vsel %vm437_vm7, %v424_v44, %v444_v46 }
  0xba   :  { %v452_v48 = vsel %vm448_vm8, %v445_v47, -inf }
  0xbb   :  { %453 = vmax.xlane.f32.xlu1 %v452_v48 }
 0x13f   :  { %v451_v54 = vpop.xlane.xlu0 %450 }
 0x140   :  { %v460_v55 = vrot.slane %v451_v54, %v3285_v17  ;;  %v464_v56 = vrot.slane %v451_v54, %v3478_v50  ;;  %v468_v57 = vrot.slane %v451_v54, %v3481_v51  ;;  %v480_v0 = vrot.slane %v451_v54, %v3484_v52 }
 0x141   :  { %v484_v13 = vrot.slane %v451_v54, %v3487_v53  ;;  %v488_v26 = vrot.slane %v451_v54, %v3493_v9  ;;  %v472_v28 = vrot.slane %v451_v54, %v3504_v24 }
 0x142   :  { %v537_v14 = vsub.f32 %v3398_v59, %v460_v55  ;;  %v538_v15 = vsub.f32 %v3404_v62, %v464_v56  ;;  %v539_v19 = vsub.f32 %v3406_v63, %v468_v57  ;;  %v542_v20 = vsub.f32 %v3413_v7, %v480_v0 }
 0x143   :  { %v543_v59 = vsub.f32 %v3423_v11, %v484_v13  ;;  %v544_v32 = vsub.f32 %v318_v31, %v488_v26  ;;  %v540_v37 = vsub.f32 %v3434_v18, %v472_v28 }
 0x144   :  { %v553_v21 = vmul.f32 1.442695, %v537_v14  ;;  %v555_v22 = vmul.f32 1.442695, %v538_v15  ;;  %v3501_v23 = vpop.xlane.xlu1 %453  ;;  %v557_v62 = vmul.f32 1.442695, %v539_v19 }
 0x145   :  { %v492_v25 = vrot.slane %v3501_v23, %v3285_v17  ;;  %v563_v63 = vmul.f32 1.442695, %v542_v20  ;;  %v496_v7 = vrot.slane %v3501_v23, %v3478_v50  ;;  %v565_v33 = vmul.f32 1.442695, %v543_v59 }
 0x146   :  { %3049 = vpow2.f32 %v553_v21  ;;  %v520_v34 = vrot.slane %v3501_v23, %v3493_v9  ;;  %v567_v12 = vmul.f32 1.442695, %v544_v32  ;;  %v559_v39 = vmul.f32 1.442695, %v540_v37 }
 0x147   :  { %3051 = vpow2.f32 %v555_v22  ;;  %v545_v27 = vsub.f32 %v3396_v58, %v492_v25  ;;  %v546_v11 = vsub.f32 %v3411_v2, %v496_v7  ;;  %v500_v58 = vrot.slane %v3501_v23, %v3481_v51 }
 0x148   :  { %3053 = vpow2.f32 %v557_v62  ;;  %v552_v31 = vsub.f32 %v342_v42, %v520_v34  ;;  %v476_v2 = vrot.slane %v451_v54, %v3518_v36  ;;  %v504_v45 = vrot.slane %v3501_v23, %v3504_v24 }
 0x149   :  { %3055 = vpow2.f32 %v563_v63  ;;  %v569_v35 = vmul.f32 1.442695, %v545_v27  ;;  %v571_v38 = vmul.f32 1.442695, %v546_v11  ;;  %v547_v43 = vsub.f32 %v3421_v10, %v500_v58 }
 0x14a   :  { %3057 = vpow2.f32 %v565_v33  ;;  %v583_v4 = vmul.f32 1.442695, %v552_v31  ;;  %v541_v42 = vsub.f32 %v3402_v61, %v476_v2  ;;  %v508_v48 = vrot.slane %v3501_v23, %v3518_v36 }
 0x14b   :  { %3059 = vpow2.f32 %v569_v35  ;;  %v573_v29 = vmul.f32 1.442695, %v547_v43  ;;  %v548_v49 = vsub.f32 %v3432_v16, %v504_v45  ;;  %v512_v55 = vrot.slane %v3501_v23, %v3484_v52 }
 0x14c   :  { %3061 = vpow2.f32 %v567_v12  ;;  %v561_v47 = vmul.f32 1.442695, %v541_v42  ;;  %v549_v56 = vsub.f32 %v3400_v60, %v508_v48  ;;  %v516_v13 = vrot.slane %v3501_v23, %v3487_v53 }
 0x14d   :  { %3063 = vpow2.f32 %v571_v38  ;;  %v575_v57 = vmul.f32 1.442695, %v548_v49  ;;  %v550_v14 = vsub.f32 %v3453_v30, %v512_v55 }
 0x14e   :  { %3065 = vpow2.f32 %v559_v39  ;;  %v577_v15 = vmul.f32 1.442695, %v549_v56  ;;  %v551_v60 = vsub.f32 %v3466_v40, %v516_v13 }
 0x14f   :  { %3067 = vpow2.f32 %v583_v4  ;;  %v579_v20 = vmul.f32 1.442695, %v550_v14 }
 0x150   :  { %3069 = vpow2.f32 %v573_v29  ;;  %v581_v22 = vmul.f32 1.442695, %v551_v60 }
 0x151   :  { %3071 = vpow2.f32 %v561_v47 }
 0x152   :  { %3073 = vpow2.f32 %v575_v57 }
 0x153   :  { %v3523_v41 = vpop.eup %3049  ;;  %3075 = vpow2.f32 %v577_v15 }
 0x154   :  { %v3527_v44 = vpop.eup %3051  ;;  %602 = vperm.xlu0 %3045, %v3523_v41   ;;  %3077 = vpow2.f32 %v579_v20 }
 0x155   :  { %605 = vperm.xlu1 %3046, %v3527_v44   ;;  %v3531_v18 = vpop.eup %3053  ;;  %3079 = vpow2.f32 %v581_v22 }
 0x156   :  { %v3536_v46 = vpop.eup %3055 }
 0x157   :  { %v3540_v10 = vpop.eup %3057 }
 0x158   :  { %617 = vperm.xlu0 %3045, %v3536_v46   ;;  %v3545_v61 = vpop.eup %3059 }
 0x159   :  { %608 = vperm.xlu1 %3046, %v3531_v18   ;;  %v3549_v54 = vpop.eup %3061 }
 0x15a   :  { %v3554_v0 = vpop.eup %3063 }
 0x15b   :  { %v3558_v16 = vpop.eup %3065 }
 0x15c   :  { %620 = vperm.xlu0 %3045, %v3540_v10   ;;  %v3563_v19 = vpop.eup %3067 }
 0x15d   :  { %626 = vperm.xlu1 %3046, %v3545_v61   ;;  %v3568_v21 = vpop.eup %3069 }
 0x15e   :  { %v3571_v23 = vpop.eup %3071 }
 0x15f   :  { %v3574_v30 = vpop.eup %3073 }
 0x160   :  { %623 = vperm.xlu0 %3045, %v3549_v54   ;;  %v3577_v25 = vpop.eup %3075 }
 0x161   :  { %629 = vperm.xlu1 %3046, %v3554_v0   ;;  %v3580_v40 = vpop.eup %3077 }
 0x162   :  { %v3583_v26 = vpop.eup %3079 }
 0x164   :  { %647 = vperm.xlu0 %3045, %v3563_v19  }
 0x165   :  { %611 = vperm.xlu1 %3046, %v3558_v16  }
 0x169   :  { %632 = vperm.xlu1 %3046, %v3568_v21  }
 0x16d   :  { %614 = vperm.xlu1 %3046, %v3571_v23  }
 0x171   :  { %635 = vperm.xlu1 %3046, %v3574_v30  }
 0x175   :  { %638 = vperm.xlu1 %3046, %v3577_v25  }
 0x179   :  { %641 = vperm.xlu1 %3046, %v3580_v40  }
 0x17d   :  { %644 = vperm.xlu1 %3046, %v3583_v26  }
 0x1cf   :  { %v603_v63 = vpop.permute.xlu0 %602 }
 0x1d0   :  { %v606_v59 = vpop.permute.xlu1 %605  ;;  %v652_v34 = vrot.slane %v603_v63, %v3417_v8 }
 0x1d1   :  { %v656_v11 = vrot.slane %v606_v59, %v3417_v8 }
 0x1d3   :  { %v618_v28 = vpop.permute.xlu0 %617  ;;  %v713_v58 = vsel %vm425_vm1, %v656_v11, %v652_v34 }
 0x1d4   :  { %v609_v62 = vpop.permute.xlu1 %608  ;;  %v672_v43 = vrot.slane %v618_v28, %v3417_v8 }
 0x1d5   :  { %v660_v37 = vrot.slane %v609_v62, %v3417_v8 }
 0x1d7   :  { %v621_v33 = vpop.permute.xlu0 %620  ;;  %v714_v38 = vsel %vm427_vm2, %v660_v37, %v713_v58 }
 0x1d8   :  { %v627_v7 = vpop.permute.xlu1 %626  ;;  %v676_v42 = vrot.slane %v621_v33, %v3417_v8 }
 0x1d9   :  { %v684_v15 = vrot.slane %v627_v7, %v3417_v8 }
 0x1db   :  { %v624_v39 = vpop.permute.xlu0 %623 }
 0x1dc   :  { %v630_v27 = vpop.permute.xlu1 %629  ;;  %v680_v29 = vrot.slane %v624_v39, %v3417_v8 }
 0x1dd   :  { %v688_v13 = vrot.slane %v630_v27, %v3417_v8 }
 0x1df   :  { %v720_v59 = vsel %vm425_vm1, %v688_v13, %v684_v15  ;;  %v648_v63 = vpop.permute.xlu0 %647 }
 0x1e0   :  { %v612_v32 = vpop.permute.xlu1 %611  ;;  %v712_v7 = vrot.slane %v648_v63, %v3417_v8 }
 0x1e1   :  { %v664_v12 = vrot.slane %v612_v32, %v3417_v8 }
 0x1e3   :  { %v715_v4 = vsel %vm429_vm3, %v664_v12, %v714_v38 }
 0x1e4   :  { %v633_v35 = vpop.permute.xlu1 %632 }
 0x1e5   :  { %v692_v14 = vrot.slane %v633_v35, %v3417_v8 }
 0x1e7   :  { %v721_v28 = vsel %vm427_vm2, %v692_v14, %v720_v59 }
 0x1e8   :  { %v615_v31 = vpop.permute.xlu1 %614 }
 0x1e9   :  { %v668_v2 = vrot.slane %v615_v31, %v3417_v8 }
 0x1eb   :  { %v716_v45 = vsel %vm431_vm4, %v668_v2, %v715_v4 }
 0x1ec   :  { %v636_v47 = vpop.permute.xlu1 %635  ;;  %v717_v48 = vsel %vm433_vm5, %v672_v43, %v716_v45 }
 0x1ed   :  { %v718_v49 = vsel %vm435_vm6, %v676_v42, %v717_v48  ;;  %v696_v60 = vrot.slane %v636_v47, %v3417_v8 }
 0x1ee   :  { %v719_v55 = vsel %vm437_vm7, %v680_v29, %v718_v49 }
 0x1ef   :  { %v729_v56 = vsel %vm448_vm8, %v719_v55, 0.0  ;;  %v722_v32 = vsel %vm429_vm3, %v696_v60, %v721_v28 }
 0x1f0   :  { %730 = vadd.xlane.f32.xlu1 %v729_v56  ;;  %v639_v57 = vpop.permute.xlu1 %638 }
 0x1f1   :  { %v700_v22 = vrot.slane %v639_v57, %v3417_v8 }
 0x1f3   :  { %v723_v27 = vsel %vm431_vm4, %v700_v22, %v722_v32  ;;  %v68_v32 = vld [vmem:[%s4861_s2 + $0x10] sm:$0xff] }
 0x1f4   :  { %v642_v20 = vpop.permute.xlu1 %641 }
 0x1f5   :  { %v704_v62 = vrot.slane %v642_v20, %v3417_v8 }
 0x1f7   :  { %v724_v11 = vsel %vm433_vm5, %v704_v62, %v723_v27 }
 0x1f8   :  { %v645_v33 = vpop.permute.xlu1 %644 }
 0x1f9   :  { %v708_v34 = vrot.slane %v645_v33, %v3417_v8  ;;  %v74_v33 = vld [vmem:[%s4861_s2 + $0x40] sm:$0xff] }
 0x1fb   :  { %v725_v35 = vsel %vm435_vm6, %v708_v34, %v724_v11  ;;  %v69_v11 = vld [vmem:[%s4861_s2 + $0x18] sm:$0xff] }
 0x1fc   :  { %v726_v37 = vsel %vm437_vm7, %v712_v7, %v725_v35  ;;  %v76_v7 = vld [vmem:[%s4861_s2 + $0x50] sm:$0xff] }
 0x1fd   :  { %v732_v12 = vsel %vm448_vm8, %v726_v37, 0.0 }
 0x1fe   :  { %733 = vadd.xlane.f32.xlu0 %v732_v12 }
 0x279   :  { %v731_v58 = vpop.xlane.xlu1 %730 }
 0x27a   :  { %3081 = vrcp.f32 %v731_v58 }
 0x287   :  { %v3082_v31 = vpop.eup %3081  ;;  %v734_v38 = vpop.xlane.xlu0 %733 }
 0x288   :  { %3083 = vrcp.f32 %v734_v38  ;;  %v746_v39 = vrot.slane %v3082_v31, %v3478_v50  ;;  %v742_v2 = vrot.slane %v3082_v31, %v3285_v17  ;;  %v750_v42 = vrot.slane %v3082_v31, %v3481_v51  ;;  %v77_v38 = vld [vmem:[%s4861_s2 + $0x58] sm:$0xff] }
 0x289   :  { %v758_v13 = vrot.slane %v3082_v31, %v3518_v36  ;;  %v762_v15 = vrot.slane %v3082_v31, %v3484_v52  ;;  %v766_v20 = vrot.slane %v3082_v31, %v3487_v53  ;;  %v770_v59 = vrot.slane %v3082_v31, %v3493_v9 }
 0x28a   :  { %v820_v43 = vmul.f32 %v3527_v44, %v746_v39  ;;  %v819_v4 = vmul.f32 %v3523_v41, %v742_v2  ;;  %v821_v45 = vmul.f32 %v3531_v18, %v750_v42  ;;  %v754_v41 = vrot.slane %v3082_v31, %v3504_v24  ;;  %v70_v39 = vld [vmem:[%s4861_s2 + $0x20] sm:$0xff] }
 0x28b   :  { %v1043_v2 = vrot.slane %v3254_v5, 1 }
 0x28c   :  { %842 = vperm.xlu1 %3046, %v820_v43   ;;  %837 = vperm.xlu0 %3045, %v819_v4   ;;  %v822_v18 = vmul.f32 %v3558_v16, %v754_v41  ;;  %v824_v16 = vmul.f32 %v3536_v46, %v762_v15  ;;  %v826_v46 = vmul.f32 %v3549_v54, %v770_v59  ;;  %v71_v41 = vld [vmem:[%s4861_s2 + $0x28] sm:$0xff] }
 0x290   :  { %847 = vperm.xlu1 %3046, %v821_v45  }
 0x295   :  { %v3084_v29 = vpop.eup %3083 }
 0x296   :  { %v778_v47 = vrot.slane %v3084_v29, %v3478_v50  ;;  %v774_v48 = vrot.slane %v3084_v29, %v3285_v17  ;;  %v782_v44 = vrot.slane %v3084_v29, %v3481_v51  ;;  %v786_v57 = vrot.slane %v3084_v29, %v3504_v24 }
 0x297   :  { %v790_v14 = vrot.slane %v3084_v29, %v3518_v36  ;;  %v794_v60 = vrot.slane %v3084_v29, %v3484_v52  ;;  %v798_v22 = vrot.slane %v3084_v29, %v3487_v53  ;;  %v802_v62 = vrot.slane %v3084_v29, %v3493_v9  ;;  %v78_v29 = vld [vmem:[%s4861_s2 + $0x60] sm:$0xff] }
 0x298   :  { %v828_v49 = vmul.f32 %v3554_v0, %v778_v47  ;;  %v827_v55 = vmul.f32 %v3545_v61, %v774_v48  ;;  %v829_v56 = vmul.f32 %v3568_v21, %v782_v44  ;;  %v830_v0 = vmul.f32 %v3574_v30, %v786_v57 }
 0x299   :  { %v823_v61 = vmul.f32 %v3571_v23, %v758_v13  ;;  %v831_v21 = vmul.f32 %v3577_v25, %v790_v14  ;;  %v832_v30 = vmul.f32 %v3580_v40, %v794_v60  ;;  %v825_v23 = vmul.f32 %v3540_v10, %v766_v20  ;;  %v33_v10 = vld [vmem:[%s4865_s6] sm:$0xff]  ;;  %v67_v40 = vld [vmem:[%s4861_s2 + $0x8] sm:$0xff]  ;;  %v3724_v60 = vld [vmem:[%s4861_s2 + $0x70] sm:$0xff] }
 0x29a   :  { %882 = vperm.xlu1 %3046, %v828_v49   ;;  %877 = vperm.xlu0 %3045, %v827_v55   ;;  %v833_v25 = vmul.f32 %v3583_v26, %v798_v22  ;;  %v834_v63 = vmul.f32 %v3563_v19, %v802_v62  ;;  %v66_v26 = vld [vmem:[%s4861_s2] sm:$0xff]  ;;  %v83_v54 = vadd.f32 %v67_v40, %v33_v10  ;;  %v75_v19 = vld [vmem:[%s4861_s2 + $0x48] sm:$0xff]  ;;  %v3734_v22 = vld [vmem:[%s4861_s2 + $0x38] sm:$0xff] }
 0x29b   :  { %v82_v28 = vadd.f32 %v66_v26, %v33_v10  ;;  %v84_v12 = vadd.f32 %v68_v32, %v33_v10  ;;  %v3674_v58 = vadd.f32 %v75_v19, %v33_v10  ;;  %v3676_v31 = vadd.f32 %v74_v33, %v33_v10 }
 0x29c   :  { %v3687_v42 = vadd.f32 %v76_v7, %v33_v10  ;;  %v3689_v45 = vadd.f32 %v69_v11, %v33_v10  ;;  %v3695_v55 = vadd.f32 %v67_v40, %v3259_v6  ;;  %v3698_v44 = vadd.f32 %v66_v26, %v3259_v6  ;;  %v3743_v40 = vld [vmem:[%s4861_s2 + $0x78] sm:$0xff] }
 0x29d   :  { %v3706_v57 = vadd.f32 %v77_v38, %v33_v10  ;;  %v3708_v13 = vadd.f32 %v70_v39, %v33_v10  ;;  %v3746_v26 = vadd.f32 %v3724_v60, %v33_v10 }
 0x29e   :  { %887 = vperm.xlu1 %3046, %v829_v56   ;;  %852 = vperm.xlu0 %3045, %v822_v18   ;;  %v79_v56 = vld [vmem:[%s4861_s2 + $0x68] sm:$0xff] }
 0x2a2   :  { %892 = vperm.xlu1 %3046, %v830_v0   ;;  %857 = vperm.xlu0 %3045, %v823_v61   ;;  %v1044_v0 = vrot.slane %v3254_v5, 2  ;;  %v3714_v61 = vld [vmem:[%s4861_s2 + $0x30] sm:$0xff] }
 0x2a6   :  { %897 = vperm.xlu1 %3046, %v831_v21   ;;  %862 = vperm.xlu0 %3045, %v824_v16   ;;  %v3716_v21 = vadd.f32 %v78_v29, %v33_v10  ;;  %v3719_v16 = vadd.f32 %v68_v32, %v3259_v6 }
 0x2aa   :  { %902 = vperm.xlu1 %3046, %v832_v30   ;;  %867 = vperm.xlu0 %3045, %v825_v23   ;;  %v3727_v30 = vadd.f32 %v71_v41, %v33_v10  ;;  %v3729_v23 = vadd.f32 %v79_v56, %v33_v10 }
 0x2ae   :  { %907 = vperm.xlu1 %3046, %v833_v25   ;;  %872 = vperm.xlu0 %3045, %v826_v46  }
 0x2b2   :  { %912 = vperm.xlu0 %3045, %v834_v63   ;;  %v3738_v63 = vadd.f32 %v3714_v61, %v33_v10 }
 0x307   :  { %v843_v27 = vpop.permute.xlu1 %842  ;;  %v838_v34 = vpop.permute.xlu0 %837 }
 0x308   :  { %v916_v35 = vmul.f32 %v843_v27, %v83_v54  ;;  %v915_v37 = vmul.f32 %v838_v34, %v82_v28  ;;  %v3749_v54 = vadd.f32 %v75_v19, %v3259_v6  ;;  %v3752_v28 = vadd.f32 %v74_v33, %v3259_v6 }
 0x30a   :  { %v938_v43 = vsel %vm294_vm0, %v916_v35, 0.0  ;;  %v931_v4 = vsel %vm294_vm0, %v915_v37, 0.0  ;;  %v3756_v37 = vadd.f32 %v3734_v22, %v33_v10 }
 0x30b   :  { %v939_v47 = vrot.slane %v938_v43, 4  ;;  %v932_v48 = vrot.slane %v931_v4, 4  ;;  %v848_v49 = vpop.permute.xlu1 %847 }
 0x30c   :  { %v917_v18 = vmul.f32 %v848_v49, %v84_v12  ;;  %v3759_v12 = vadd.f32 %v3743_v40, %v33_v10  ;;  %v3774_v10 = vadd.f32 %v70_v39, %v3259_v6 }
 0x30d   :  { %v940_v14 = vadd.f32 %v939_v47, %v938_v43  ;;  %v933_v15 = vadd.f32 %v932_v48, %v931_v4  ;;  %v3762_v43 = vadd.f32 %v76_v7, %v3259_v6  ;;  %v3766_v4 = vadd.f32 %v69_v11, %v3259_v6 }
 0x30e   :  { %v945_v20 = vsel %vm294_vm0, %v917_v18, 0.0  ;;  %v3770_v18 = vadd.f32 %v77_v38, %v3259_v6  ;;  %v3781_v38 = vadd.f32 %v78_v29, %v3259_v6  ;;  %v3797_v29 = vadd.f32 %v79_v56, %v3259_v6 }
 0x30f   :  { %v941_v25 = vrot.slane %v940_v14, 2  ;;  %v934_v46 = vrot.slane %v933_v15, 2  ;;  %v946_v62 = vrot.slane %v945_v20, 4  ;;  %v3808_v56 = vadd.f32 %v3714_v61, %v3259_v6 }
 0x311   :  { %v942_v27 = vadd.f32 %v941_v25, %v940_v14  ;;  %v935_v34 = vadd.f32 %v934_v46, %v933_v15  ;;  %v947_v35 = vadd.f32 %v946_v62, %v945_v20  ;;  %v3784_v14 = vadd.f32 %v71_v41, %v3259_v6 }
 0x313   :  { %v943_v33 = vrot.slane %v942_v27, 1  ;;  %v936_v47 = vrot.slane %v935_v34, 1  ;;  %v948_v48 = vrot.slane %v947_v35, 2 }
 0x315   :  { %v949_v15 = vadd.f32 %v948_v48, %v947_v35  ;;  %v883_v20 = vpop.permute.xlu1 %882  ;;  %v878_v25 = vpop.permute.xlu0 %877  ;;  %v944_v11 = vadd.f32 %v943_v33, %v942_v27  ;;  %v937_v46 = vadd.f32 %v936_v47, %v935_v34 }
 0x316   :  { %v924_v19 = vmul.f32 %v883_v20, %v3674_v58  ;;  %v923_v49 = vmul.f32 %v878_v25, %v3676_v31 }
 0x317   :  { %v950_v39 = vrot.slane %v949_v15, 1  ;;  %v3788_v35 = vadd.f32 %v1043_v2, %v944_v11  ;;  %v3791_v27 = vadd.f32 %v937_v46, %v3254_v5 }
 0x318   :  { %v994_v58 = vsel %vm294_vm0, %v924_v19, 0.0  ;;  %v987_v31 = vsel %vm294_vm0, %v923_v49, 0.0 }
 0x319   :  { %v995_v33 = vrot.slane %v994_v58, 4  ;;  %v988_v47 = vrot.slane %v987_v31, 4  ;;  %v888_v48 = vpop.permute.xlu1 %887  ;;  %v853_v20 = vpop.permute.xlu0 %852  ;;  %v1144_v2 = vrot.slane %v3788_v35, %v3285_v17  ;;  %v1140_v25 = vrot.slane %v3791_v27, %v3285_v17 }
 0x31a   :  { %v925_v11 = vmul.f32 %v888_v48, %v3687_v42  ;;  %v918_v19 = vmul.f32 %v853_v20, %v3689_v45  ;;  %v951_v49 = vadd.f32 %v950_v39, %v949_v15 }
 0x31b   :  { %v996_v46 = vadd.f32 %v995_v33, %v994_v58  ;;  %v989_v41 = vadd.f32 %v988_v47, %v987_v31  ;;  %v1202_v34 = vmul.f32 %v1144_v2, %v3695_v55  ;;  %v1201_v62 = vmul.f32 %v1140_v25, %v3698_v44 }
 0x31c   :  { %v1001_v7 = vsel %vm294_vm0, %v925_v11, 0.0  ;;  %v952_v32 = vsel %vm294_vm0, %v918_v19, 0.0  ;;  %v3816_v42 = vadd.f32 %v1044_v0, %v951_v49 }
 0x31d   :  { %v997_v15 = vrot.slane %v996_v46, 2  ;;  %v990_v39 = vrot.slane %v989_v41, 2  ;;  %v1002_v6 = vrot.slane %v1001_v7, 4  ;;  %v953_v61 = vrot.slane %v952_v32, 4  ;;  %v893_v58 = vpop.permute.xlu1 %892  ;;  %v858_v31 = vpop.permute.xlu0 %857 }
 0x31e   :  { %4901 = vst [vmem:[#allocation14_spill] sm:$0xff] %v3816_v42  ;;  %v926_v55 = vmul.f32 %v893_v58, %v3706_v57  ;;  %v919_v44 = vmul.f32 %v858_v31, %v3708_v13  ;;  %v1220_v33 = vsel %vm294_vm0, %v1202_v34, 0.0  ;;  %v1217_v47 = vsel %vm294_vm0, %v1201_v62, 0.0  ;;  %v3830_v57 = vld [vmem:[%s4859_s0] sm:$0xff] }
 0x31f   :  { %v998_v48 = vadd.f32 %v997_v15, %v996_v46  ;;  %v991_v20 = vadd.f32 %v990_v39, %v989_v41  ;;  %v1003_v0 = vadd.f32 %v1002_v6, %v1001_v7  ;;  %v954_v2 = vadd.f32 %v953_v61, %v952_v32  ;;  %1221 = vadd.xlane.f32.xlu0 %v1220_v33 }
 0x320   :  { %v1008_v25 = vsel %vm294_vm0, %v926_v55, 0.0  ;;  %v959_v11 = vsel %vm294_vm0, %v919_v44, 0.0  ;;  %1218 = vadd.xlane.f32.xlu1 %v1217_v47  ;;  %v1148_v19 = vrot.slane %v3816_v42, %v3285_v17 }
 0x321   :  { %v999_v62 = vrot.slane %v998_v48, 1  ;;  %v992_v34 = vrot.slane %v991_v20, 1  ;;  %v1004_v7 = vrot.slane %v1003_v0, 2  ;;  %v955_v32 = vrot.slane %v954_v2, 2  ;;  %v898_v41 = vpop.permute.xlu1 %897  ;;  %v863_v49 = vpop.permute.xlu0 %862 }
 0x322   :  { %v1009_v46 = vrot.slane %v1008_v25, 4  ;;  %v960_v15 = vrot.slane %v959_v11, 4  ;;  %v927_v39 = vmul.f32 %v898_v41, %v3716_v21  ;;  %v920_v6 = vmul.f32 %v863_v49, %v3727_v30 }
 0x323   :  { %v1005_v61 = vadd.f32 %v1004_v7, %v1003_v0  ;;  %v3835_v58 = vadd.f32 %v955_v32, %v954_v2  ;;  %v1203_v31 = vmul.f32 %v1148_v19, %v3719_v16  ;;  %v1000_v55 = vadd.f32 %v999_v62, %v998_v48 }
 0x324   :  { %v1010_v44 = vadd.f32 %v1009_v46, %v1008_v25  ;;  %v961_v33 = vadd.f32 %v960_v15, %v959_v11  ;;  %v1015_v47 = vsel %vm294_vm0, %v927_v39, 0.0  ;;  %v966_v13 = vsel %vm294_vm0, %v920_v6, 0.0 }
 0x325   :  { %v1006_v45 = vrot.slane %v1005_v61, 1  ;;  %v1016_v1 = vrot.slane %v1015_v47, 4  ;;  %v967_v42 = vrot.slane %v966_v13, 4  ;;  %v903_v21 = vpop.permute.xlu1 %902  ;;  %v868_v41 = vpop.permute.xlu0 %867  ;;  %v1223_v2 = vsel %vm294_vm0, %v1203_v31, 0.0 }
 0x326   :  { %v1011_v30 = vrot.slane %v1010_v44, 2  ;;  %v962_v0 = vrot.slane %v961_v33, 2  ;;  %v928_v16 = vmul.f32 %v903_v21, %v3729_v23  ;;  %1224 = vadd.xlane.f32.xlu0 %v1223_v2  ;;  %v921_v11 = vmul.f32 %v868_v41, %v3738_v63 }
 0x327   :  { %v1017_v48 = vadd.f32 %v1016_v1, %v1015_v47  ;;  %v968_v25 = vadd.f32 %v967_v42, %v966_v13  ;;  %v4902_v19 = vrot.slane %v3246_v3, 1  ;;  %v993_v46 = vadd.f32 %v992_v34, %v991_v20 }
 0x328   :  { %v1012_v7 = vadd.f32 %v1011_v30, %v1010_v44  ;;  %v963_v32 = vadd.f32 %v962_v0, %v961_v33  ;;  %v1022_v49 = vsel %vm294_vm0, %v928_v16, 0.0  ;;  %v973_v31 = vsel %vm294_vm0, %v921_v11, 0.0  ;;  %v3858_v30 = vld [vmem:[%s4859_s0 + $0x8] sm:$0xff] }
 0x329   :  { %v3846_v62 = vadd.f32 %v4902_v19, %v1000_v55  ;;  %v1018_v15 = vrot.slane %v1017_v48, 2  ;;  %v969_v39 = vrot.slane %v968_v25, 2  ;;  %v1023_v6 = vrot.slane %v1022_v49, 4  ;;  %v908_v23 = vpop.permute.xlu1 %907  ;;  %v873_v1 = vpop.permute.xlu0 %872 }
 0x32a   :  { %v1013_v42 = vrot.slane %v1012_v7, 1  ;;  %v964_v13 = vrot.slane %v963_v32, 1  ;;  %v974_v47 = vrot.slane %v973_v31, 4  ;;  %v929_v63 = vmul.f32 %v908_v23, %v3746_v26 }
 0x32b   :  { %4903 = vst [vmem:[#allocation15_spill] sm:$0xff] %v3846_v62  ;;  %v1019_v21 = vadd.f32 %v1018_v15, %v1017_v48  ;;  %v970_v55 = vadd.f32 %v969_v39, %v968_v25  ;;  %v1024_v41 = vadd.f32 %v1023_v6, %v1022_v49  ;;  %v922_v44 = vmul.f32 %v873_v1, %v3756_v37 }
 0x32c   :  { %v975_v33 = vadd.f32 %v974_v47, %v973_v31  ;;  %v1029_v20 = vsel %vm294_vm0, %v929_v63, 0.0  ;;  %v1176_v34 = vrot.slane %v3846_v62, %v3285_v17  ;;  %v3861_v0 = vadd.f32 %v3858_v30, %v993_v46 }
 0x32d   :  { %v1020_v26 = vrot.slane %v1019_v21, 1  ;;  %v971_v2 = vrot.slane %v970_v55, 1  ;;  %v1025_v16 = vrot.slane %v1024_v41, 2  ;;  %v1030_v48 = vrot.slane %v1029_v20, 4  ;;  %v913_v25 = vpop.permute.xlu0 %912 }
 0x32e   :  { %v976_v37 = vrot.slane %v975_v33, 2  ;;  %v980_v11 = vsel %vm294_vm0, %v922_v44, 0.0  ;;  %v1210_v19 = vmul.f32 %v1176_v34, %v3749_v54  ;;  %v1172_v49 = vrot.slane %v3861_v0, %v3285_v17 }
 0x32f   :  { %v1026_v15 = vadd.f32 %v1025_v16, %v1024_v41  ;;  %v1031_v39 = vadd.f32 %v1030_v48, %v1029_v20  ;;  %v981_v6 = vrot.slane %v980_v11, 4  ;;  %v930_v31 = vmul.f32 %v913_v25, %v3759_v12 }
 0x330   :  { %v977_v46 = vadd.f32 %v976_v37, %v975_v33  ;;  %v1244_v23 = vsel %vm294_vm0, %v1210_v19, 0.0  ;;  %v1209_v1 = vmul.f32 %v1172_v49, %v3752_v28  ;;  %v1007_v47 = vadd.f32 %v1006_v45, %v1005_v61 }
 0x331   :  { %v1027_v63 = vrot.slane %v1026_v15, 1  ;;  %v1032_v59 = vrot.slane %v1031_v39, 2  ;;  %v982_v62 = vadd.f32 %v981_v6, %v980_v11  ;;  %1245 = vadd.xlane.f32.xlu0 %v1244_v23  ;;  %v1036_v54 = vsel %vm294_vm0, %v930_v31, 0.0 }
 0x332   :  { %v978_v44 = vrot.slane %v977_v46, 1  ;;  %v1241_v34 = vsel %vm294_vm0, %v1209_v1, 0.0  ;;  %v1037_v41 = vrot.slane %v1036_v54, 4  ;;  %v4904_v20 = vrot.slane %v3246_v3, 2 }
 0x333   :  { %v1033_v12 = vadd.f32 %v1032_v59, %v1031_v39  ;;  %v983_v33 = vrot.slane %v982_v62, 2  ;;  %1242 = vadd.xlane.f32.xlu1 %v1241_v34  ;;  %v4905_v28 = vrot.slane %v3835_v58, 1  ;;  %v1014_v61 = vadd.f32 %v1013_v42, %v1012_v7 }
 0x334   :  { %v3874_v16 = vadd.f32 %v4904_v20, %v1007_v47  ;;  %v1038_v48 = vadd.f32 %v1037_v41, %v1036_v54  ;;  %v965_v37 = vadd.f32 %v964_v13, %v963_v32  ;;  %v1021_v11 = vadd.f32 %v1020_v26, %v1019_v21 }
 0x335   :  { %v958_v45 = vadd.f32 %v4905_v28, %v3835_v58  ;;  %v1034_v19 = vrot.slane %v1033_v12, 1  ;;  %v984_v49 = vadd.f32 %v983_v33, %v982_v62  ;;  %v4906_v6 = vrot.slane %v3254_v5, 3 }
 0x336   :  { %v1180_v25 = vrot.slane %v3874_v16, %v3285_v17  ;;  %v4907_v59 = vrot.slane %v3246_v3, 3  ;;  %v1039_v23 = vrot.slane %v1038_v48, 2  ;;  %v4908_v7 = vrot.slane %v3254_v5, 4 }
 0x337   :  { %v3883_v31 = vadd.f32 %v4906_v6, %v958_v45  ;;  %v4909_v32 = vrot.slane %v3246_v3, 4  ;;  %v985_v62 = vrot.slane %v984_v49, 1  ;;  %v972_v1 = vadd.f32 %v971_v2, %v970_v55 }
 0x338   :  { %v3887_v39 = vadd.f32 %v4907_v59, %v1014_v61  ;;  %v1211_v58 = vmul.f32 %v1180_v25, %v3762_v43  ;;  %v3892_v42 = vadd.f32 %v4908_v7, %v965_v37  ;;  %v1040_v47 = vadd.f32 %v1039_v23, %v1038_v48 }
 0x339   :  { %v3896_v13 = vadd.f32 %v4909_v32, %v1021_v11  ;;  %v1152_v21 = vrot.slane %v3883_v31, %v3285_v17  ;;  %v4910_v33 = vrot.slane %v3254_v5, 5  ;;  %v1028_v45 = vadd.f32 %v1027_v63, %v1026_v15 }
 0x33a   :  { %v1184_v26 = vrot.slane %v3887_v39, %v3285_v17  ;;  %v1247_v54 = vsel %vm294_vm0, %v1211_v58, 0.0  ;;  %v1156_v43 = vrot.slane %v3892_v42, %v3285_v17  ;;  %v1041_v55 = vrot.slane %v1040_v47, 1 }
 0x33b   :  { %v1188_v34 = vrot.slane %v3896_v13, %v3285_v17  ;;  %1248 = vadd.xlane.f32.xlu0 %v1247_v54  ;;  %v1204_v41 = vmul.f32 %v1152_v21, %v3766_v4  ;;  %v3911_v28 = vadd.f32 %v4910_v33, %v972_v1  ;;  %v979_v48 = vadd.f32 %v978_v44, %v977_v46 }
 0x33c   :  { %v1212_v20 = vmul.f32 %v1184_v26, %v3770_v18  ;;  %v1205_v2 = vmul.f32 %v1156_v43, %v3774_v10  ;;  %v4911_v18 = vrot.slane %v3246_v3, 5  ;;  %v4912_v63 = vrot.slane %v3254_v5, 6 }
 0x33d   :  { %v1213_v61 = vmul.f32 %v1188_v34, %v3781_v38  ;;  %v1226_v25 = vsel %vm294_vm0, %v1204_v41, 0.0  ;;  %v1160_v4 = vrot.slane %v3911_v28, %v3285_v17  ;;  %v1035_v38 = vadd.f32 %v1034_v19, %v1033_v12 }
 0x33e   :  { %v1250_v37 = vsel %vm294_vm0, %v1212_v20, 0.0  ;;  %v3921_v11 = vadd.f32 %v4911_v18, %v1028_v45  ;;  %1227 = vadd.xlane.f32.xlu1 %v1226_v25  ;;  %v1229_v15 = vsel %vm294_vm0, %v1205_v2, 0.0  ;;  %v3926_v10 = vadd.f32 %v4912_v63, %v979_v48 }
 0x33f   :  { %v1056_v46 = vrot.slane %v3858_v30, 7  ;;  %1251 = vadd.xlane.f32.xlu0 %v1250_v37  ;;  %v1206_v44 = vmul.f32 %v1160_v4, %v3784_v14  ;;  %v986_v59 = vadd.f32 %v985_v62, %v984_v49  ;;  %v1042_v23 = vadd.f32 %v1041_v55, %v1040_v47  ;;  %v3942_v30 = vld [vmem:[%s4864_s5] sm:$0xff] }
 0x340   :  { %v1192_v6 = vrot.slane %v3921_v11, %v3285_v17  ;;  %v1253_v58 = vsel %vm294_vm0, %v1213_v61, 0.0  ;;  %v1164_v7 = vrot.slane %v3926_v10, %v3285_v17  ;;  %v4913_v5 = vrot.slane %v3246_v3, 6 }
 0x341   :  { %v1103_v14 = vadd.f32 %v3942_v30, %v3724_v60  ;;  %v4915_v19 = vrot.slane %v3830_v57, 7  ;;  %v1096_v62 = vadd.f32 %v3942_v30, %v3734_v22  ;;  %v1232_v21 = vsel %vm294_vm0, %v1206_v44, 0.0 }
 0x342   :  { %v3937_v32 = vadd.f32 %v4913_v5, %v1035_v38  ;;  %v1214_v12 = vmul.f32 %v1192_v6, %v3797_v29  ;;  %1230 = vadd.xlane.f32.xlu1 %v1229_v15  ;;  %v1207_v26 = vmul.f32 %v1164_v7, %v3808_v56  ;;  %v3959_v29 = vadd.f32 %v1056_v46, %v1042_v23 }
 0x343   :  { %v3949_v49 = vadd.f32 %v4915_v19, %v986_v59  ;;  %1254 = vadd.xlane.f32.xlu0 %v1253_v58  ;;  %v1104_v22 = vadd.f32 %v3942_v30, %v3743_v40 }
 0x344   :  { %4914 = vst [vmem:[#allocation16_spill] sm:$0xff] %v3937_v32  ;;  %v1196_v3 = vrot.slane %v3937_v32, %v3285_v17  ;;  %4917 = vst [vmem:[#allocation18_spill] sm:$0xff] %v3959_v29  ;;  %v1256_v57 = vsel %vm294_vm0, %v1214_v12, 0.0  ;;  %v1235_v47 = vsel %vm294_vm0, %v1207_v26, 0.0  ;;  %v1200_v43 = vrot.slane %v3959_v29, %v3285_v17 }
 0x345   :  { %4916 = vst [vmem:[#allocation17_spill] sm:$0xff] %v3949_v49  ;;  %v1168_v60 = vrot.slane %v3949_v49, %v3285_v17 }
 0x346   :  { %v1215_v1 = vmul.f32 %v1196_v3, %v1103_v14  ;;  %1233 = vadd.xlane.f32.xlu1 %v1232_v21  ;;  %v1216_v41 = vmul.f32 %v1200_v43, %v1104_v22 }
 0x347   :  { %1257 = vadd.xlane.f32.xlu0 %v1256_v57  ;;  %v1208_v54 = vmul.f32 %v1168_v60, %v1096_v62 }
 0x348   :  { %v1259_v56 = vsel %vm294_vm0, %v1215_v1, 0.0  ;;  %v1262_v20 = vsel %vm294_vm0, %v1216_v41, 0.0 }
 0x349   :  { %v1238_v34 = vsel %vm294_vm0, %v1208_v54, 0.0 }
 0x34a   :  { %1236 = vadd.xlane.f32.xlu1 %v1235_v47 }
 0x34b   :  { %1260 = vadd.xlane.f32.xlu0 %v1259_v56 }
 0x34e   :  { %1239 = vadd.xlane.f32.xlu1 %v1238_v34 }
 0x352   :  { %1263 = vadd.xlane.f32.xlu1 %v1262_v20 }
 0x3a8   :  { %v1222_v33 = vpop.xlane.xlu0 %1221 }
 0x3a9   :  { %v1219_v55 = vpop.xlane.xlu1 %1218  ;;  %v1288_v63 = vrot.slane %v1222_v33, %v3417_v8 }
 0x3aa   :  { %v1284_v15 = vrot.slane %v1219_v55, %v3417_v8 }
 0x3ac   :  { %v1345_v23 = vsel %vm425_vm1, %v1288_v63, %v1284_v15 }
 0x3af   :  { %v1225_v45 = vpop.xlane.xlu0 %1224 }
 0x3b0   :  { %v1292_v46 = vrot.slane %v1225_v45, %v3417_v8 }
 0x3b2   :  { %v1346_v14 = vsel %vm427_vm2, %v1292_v46, %v1345_v23 }
 0x3ba   :  { %v3970_v2 = vpop.xlane.xlu0 %1245 }
 0x3bb   :  { %v1320_v7 = vrot.slane %v3970_v2, %v3417_v8 }
 0x3bc   :  { %v3972_v40 = vpop.xlane.xlu1 %1242 }
 0x3bd   :  { %v1316_v58 = vrot.slane %v3972_v40, %v3417_v8 }
 0x3bf   :  { %v1352_v1 = vsel %vm425_vm1, %v1320_v7, %v1316_v58 }
 0x3c4   :  { %v3974_v61 = vpop.xlane.xlu0 %1248 }
 0x3c5   :  { %v1324_v12 = vrot.slane %v3974_v61, %v3417_v8 }
 0x3c7   :  { %v3976_v48 = vpop.xlane.xlu1 %1227  ;;  %v1353_v43 = vsel %vm427_vm2, %v1324_v12, %v1352_v1 }
 0x3c8   :  { %v3978_v25 = vpop.xlane.xlu0 %1251  ;;  %v1296_v44 = vrot.slane %v3976_v48, %v3417_v8 }
 0x3c9   :  { %v1328_v62 = vrot.slane %v3978_v25, %v3417_v8 }
 0x3ca   :  { %v1347_v3 = vsel %vm429_vm3, %v1296_v44, %v1346_v14 }
 0x3cb   :  { %v3980_v37 = vpop.xlane.xlu1 %1230  ;;  %v1354_v41 = vsel %vm429_vm3, %v1328_v62, %v1353_v43 }
 0x3cc   :  { %v3982_v4 = vpop.xlane.xlu0 %1254  ;;  %v1300_v6 = vrot.slane %v3980_v37, %v3417_v8 }
 0x3cd   :  { %v1332_v60 = vrot.slane %v3982_v4, %v3417_v8 }
 0x3ce   :  { %v1348_v26 = vsel %vm431_vm4, %v1300_v6, %v1347_v3 }
 0x3cf   :  { %v3984_v18 = vpop.xlane.xlu1 %1233  ;;  %v1355_v15 = vsel %vm431_vm4, %v1332_v60, %v1354_v41 }
 0x3d0   :  { %v3988_v38 = vpop.xlane.xlu0 %1257  ;;  %v1304_v5 = vrot.slane %v3984_v18, %v3417_v8 }
 0x3d1   :  { %v1336_v47 = vrot.slane %v3988_v38, %v3417_v8 }
 0x3d2   :  { %v1349_v22 = vsel %vm433_vm5, %v1304_v5, %v1348_v26 }
 0x3d3   :  { %v3995_v59 = vpop.xlane.xlu1 %1236  ;;  %v1356_v6 = vsel %vm433_vm5, %v1336_v47, %v1355_v15 }
 0x3d4   :  { %v1308_v19 = vrot.slane %v3995_v59, %v3417_v8  ;;  %v4012_v21 = vpop.xlane.xlu0 %1260 }
 0x3d5   :  { %v1340_v56 = vrot.slane %v4012_v21, %v3417_v8 }
 0x3d6   :  { %v1350_v34 = vsel %vm435_vm6, %v1308_v19, %v1349_v22 }
 0x3d7   :  { %v4017_v57 = vpop.xlane.xlu1 %1239  ;;  %v1357_v23 = vsel %vm435_vm6, %v1340_v56, %v1356_v6 }
 0x3d8   :  { %v1312_v54 = vrot.slane %v4017_v57, %v3417_v8 }
 0x3da   :  { %v1351_v20 = vsel %vm437_vm7, %v1312_v54, %v1350_v34 }
 0x3db   :  { %v4032_v63 = vpop.xlane.xlu1 %1263  ;;  %v1361_v46 = vsel %vm448_vm8, %v1351_v20, -inf }
 0x3dc   :  { %v1344_v44 = vrot.slane %v4032_v63, %v3417_v8  ;;  %1362 = vmax.xlane.f32.xlu0 %v1361_v46 }
 0x3de   :  { %v1358_v58 = vsel %vm437_vm7, %v1344_v44, %v1357_v23 }
 0x3df   :  { %v1364_v7 = vsel %vm448_vm8, %v1358_v58, -inf }
 0x3e0   :  { %1365 = vmax.xlane.f32.xlu1 %v1364_v7 }
 0x465   :  { %v1363_v5 = vpop.xlane.xlu0 %1362 }
 0x466   :  { %v1372_v14 = vrot.slane %v1363_v5, %v3285_v17  ;;  %v1376_v12 = vrot.slane %v1363_v5, %v3478_v50  ;;  %v1380_v19 = vrot.slane %v1363_v5, %v3481_v51  ;;  %v1384_v43 = vrot.slane %v1363_v5, %v3504_v24 }
 0x467   :  { %v1388_v34 = vrot.slane %v1363_v5, %v3518_v36  ;;  %v1392_v6 = vrot.slane %v1363_v5, %v3484_v52  ;;  %v1396_v7 = vrot.slane %v1363_v5, %v3487_v53 }
 0x468   :  { %v1449_v3 = vsub.f32 %v1219_v55, %v1372_v14  ;;  %v1450_v62 = vsub.f32 %v1222_v33, %v1376_v12  ;;  %v1451_v26 = vsub.f32 %v1225_v45, %v1380_v19  ;;  %v1452_v41 = vsub.f32 %v3976_v48, %v1384_v43 }
 0x469   :  { %v4044_v60 = vpop.xlane.xlu1 %1365  ;;  %v1453_v23 = vsub.f32 %v3980_v37, %v1388_v34  ;;  %v1454_v14 = vsub.f32 %v3984_v18, %v1392_v6  ;;  %v1455_v18 = vsub.f32 %v3995_v59, %v1396_v7 }
 0x46a   :  { %v1465_v1 = vmul.f32 1.442695, %v1449_v3  ;;  %v1467_v47 = vmul.f32 1.442695, %v1450_v62  ;;  %v1404_v54 = vrot.slane %v4044_v60, %v3285_v17  ;;  %v1408_v22 = vrot.slane %v4044_v60, %v3478_v50 }
 0x46b   :  { %v1469_v56 = vmul.f32 1.442695, %v1451_v26  ;;  %v1412_v55 = vrot.slane %v4044_v60, %v3481_v51  ;;  %v1416_v20 = vrot.slane %v4044_v60, %v3504_v24  ;;  %v1471_v58 = vmul.f32 1.442695, %v1452_v41 }
 0x46c   :  { %3085 = vpow2.f32 %v1465_v1  ;;  %v1457_v33 = vsub.f32 %v3972_v40, %v1404_v54  ;;  %v1458_v45 = vsub.f32 %v3970_v2, %v1408_v22  ;;  %v1420_v2 = vrot.slane %v4044_v60, %v3518_v36 }
 0x46d   :  { %3087 = vpow2.f32 %v1467_v47  ;;  %v1459_v15 = vsub.f32 %v3974_v61, %v1412_v55  ;;  %v1460_v40 = vsub.f32 %v3978_v25, %v1416_v20  ;;  %v1473_v61 = vmul.f32 1.442695, %v1453_v23 }
 0x46e   :  { %3089 = vpow2.f32 %v1469_v56  ;;  %v1481_v46 = vmul.f32 1.442695, %v1457_v33  ;;  %v1483_v44 = vmul.f32 1.442695, %v1458_v45  ;;  %v1424_v37 = vrot.slane %v4044_v60, %v3484_v52 }
 0x46f   :  { %v1485_v48 = vmul.f32 1.442695, %v1459_v15  ;;  %v1461_v19 = vsub.f32 %v3982_v4, %v1420_v2  ;;  %v1487_v3 = vmul.f32 1.442695, %v1460_v40  ;;  %v1400_v25 = vrot.slane %v1363_v5, %v3493_v9 }
 0x470   :  { %3091 = vpow2.f32 %v1481_v46  ;;  %v1475_v26 = vmul.f32 1.442695, %v1454_v14  ;;  %v1428_v1 = vrot.slane %v4044_v60, %v3487_v53  ;;  %v1462_v47 = vsub.f32 %v3988_v38, %v1424_v37 }
 0x471   :  { %3093 = vpow2.f32 %v1483_v44  ;;  %v1489_v4 = vmul.f32 1.442695, %v1461_v19  ;;  %v1456_v22 = vsub.f32 %v4017_v57, %v1400_v25  ;;  %v1477_v43 = vmul.f32 1.442695, %v1455_v18 }
 0x472   :  { %3095 = vpow2.f32 %v1471_v58  ;;  %v1432_v59 = vrot.slane %v4044_v60, %v3493_v9  ;;  %v1463_v56 = vsub.f32 %v4012_v21, %v1428_v1  ;;  %v1491_v55 = vmul.f32 1.442695, %v1462_v47 }
 0x473   :  { %3097 = vpow2.f32 %v1485_v48  ;;  %v1479_v33 = vmul.f32 1.442695, %v1456_v22 }
 0x474   :  { %3099 = vpow2.f32 %v1473_v61  ;;  %v1464_v57 = vsub.f32 %v4032_v63, %v1432_v59  ;;  %v1493_v60 = vmul.f32 1.442695, %v1463_v56 }
 0x475   :  { %3101 = vpow2.f32 %v1487_v3 }
 0x476   :  { %3103 = vpow2.f32 %v1475_v26  ;;  %v1495_v21 = vmul.f32 1.442695, %v1464_v57 }
 0x477   :  { %3105 = vpow2.f32 %v1489_v4 }
 0x478   :  { %3107 = vpow2.f32 %v1477_v43 }
 0x479   :  { %v4067_v12 = vpop.eup %3085  ;;  %3109 = vpow2.f32 %v1491_v55 }
 0x47a   :  { %v4072_v62 = vpop.eup %3087  ;;  %1514 = vperm.xlu0 %3045, %v4067_v12   ;;  %3111 = vpow2.f32 %v1479_v33 }
 0x47b   :  { %1517 = vperm.xlu1 %3046, %v4072_v62   ;;  %v4081_v54 = vpop.eup %3089  ;;  %3113 = vpow2.f32 %v1493_v60 }
 0x47c   :  { %3115 = vpow2.f32 %v1495_v21 }
 0x47d   :  { %v4087_v5 = vpop.eup %3091 }
 0x47e   :  { %v4090_v38 = vpop.eup %3093  ;;  %1538 = vperm.xlu0 %3045, %v4087_v5  }
 0x47f   :  { %1520 = vperm.xlu1 %3046, %v4081_v54   ;;  %v4095_v45 = vpop.eup %3095 }
 0x480   :  { %v4097_v34 = vpop.eup %3097 }
 0x481   :  { %v4101_v41 = vpop.eup %3099 }
 0x482   :  { %1523 = vperm.xlu0 %3045, %v4095_v45   ;;  %v4103_v20 = vpop.eup %3101 }
 0x483   :  { %1541 = vperm.xlu1 %3046, %v4090_v38   ;;  %v4107_v63 = vpop.eup %3103 }
 0x484   :  { %v4109_v15 = vpop.eup %3105 }
 0x485   :  { %v4113_v46 = vpop.eup %3107 }
 0x486   :  { %1526 = vperm.xlu0 %3045, %v4101_v41   ;;  %v4115_v44 = vpop.eup %3109 }
 0x487   :  { %1544 = vperm.xlu1 %3046, %v4097_v34   ;;  %v4119_v6 = vpop.eup %3111 }
 0x488   :  { %v4121_v23 = vpop.eup %3113 }
 0x489   :  { %v4125_v58 = vpop.eup %3115 }
 0x48a   :  { %1529 = vperm.xlu0 %3045, %v4107_v63  }
 0x48b   :  { %1547 = vperm.xlu1 %3046, %v4103_v20  }
 0x48e   :  { %1532 = vperm.xlu0 %3045, %v4113_v46  }
 0x48f   :  { %1550 = vperm.xlu1 %3046, %v4109_v15  }
 0x492   :  { %1535 = vperm.xlu0 %3045, %v4119_v6  }
 0x493   :  { %1553 = vperm.xlu1 %3046, %v4115_v44  }
 0x496   :  { %1559 = vperm.xlu0 %3045, %v4125_v58  }
 0x497   :  { %1556 = vperm.xlu1 %3046, %v4121_v23  }
 0x4f5   :  { %v1515_v40 = vpop.permute.xlu0 %1514 }
 0x4f6   :  { %v1518_v2 = vpop.permute.xlu1 %1517  ;;  %v1564_v26 = vrot.slane %v1515_v40, %v3417_v8 }
 0x4f7   :  { %v1568_v18 = vrot.slane %v1518_v2, %v3417_v8 }
 0x4f9   :  { %v1539_v7 = vpop.permute.xlu0 %1538  ;;  %v1625_v55 = vsel %vm425_vm1, %v1568_v18, %v1564_v26 }
 0x4fa   :  { %v1521_v48 = vpop.permute.xlu1 %1520  ;;  %v1596_v33 = vrot.slane %v1539_v7, %v3417_v8 }
 0x4fb   :  { %v1572_v47 = vrot.slane %v1521_v48, %v3417_v8 }
 0x4fd   :  { %v1524_v61 = vpop.permute.xlu0 %1523  ;;  %v1626_v2 = vsel %vm427_vm2, %v1572_v47, %v1625_v55 }
 0x4fe   :  { %v1542_v14 = vpop.permute.xlu1 %1541  ;;  %v1576_v22 = vrot.slane %v1524_v61, %v3417_v8 }
 0x4ff   :  { %v1600_v4 = vrot.slane %v1542_v14, %v3417_v8 }
 0x500   :  { %v1627_v61 = vsel %vm429_vm3, %v1576_v22, %v1626_v2 }
 0x501   :  { %v1527_v19 = vpop.permute.xlu0 %1526  ;;  %v1632_v14 = vsel %vm425_vm1, %v1600_v4, %v1596_v33 }
 0x502   :  { %v1545_v37 = vpop.permute.xlu1 %1544  ;;  %v1580_v59 = vrot.slane %v1527_v19, %v3417_v8 }
 0x503   :  { %v1604_v43 = vrot.slane %v1545_v37, %v3417_v8 }
 0x504   :  { %v1628_v7 = vsel %vm431_vm4, %v1580_v59, %v1627_v61 }
 0x505   :  { %v1530_v25 = vpop.permute.xlu0 %1529  ;;  %v1633_v19 = vsel %vm427_vm2, %v1604_v43, %v1632_v14 }
 0x506   :  { %v1548_v3 = vpop.permute.xlu1 %1547  ;;  %v1584_v60 = vrot.slane %v1530_v25, %v3417_v8 }
 0x507   :  { %v1608_v57 = vrot.slane %v1548_v3, %v3417_v8 }
 0x508   :  { %v1629_v18 = vsel %vm433_vm5, %v1584_v60, %v1628_v7 }
 0x509   :  { %v1533_v56 = vpop.permute.xlu0 %1532  ;;  %v1634_v25 = vsel %vm429_vm3, %v1608_v57, %v1633_v19 }
 0x50a   :  { %v1551_v1 = vpop.permute.xlu1 %1550  ;;  %v1588_v48 = vrot.slane %v1533_v56, %v3417_v8 }
 0x50b   :  { %v1612_v40 = vrot.slane %v1551_v1, %v3417_v8 }
 0x50c   :  { %v1630_v22 = vsel %vm435_vm6, %v1588_v48, %v1629_v18 }
 0x50d   :  { %v1536_v3 = vpop.permute.xlu0 %1535  ;;  %v1635_v47 = vsel %vm431_vm4, %v1612_v40, %v1634_v25 }
 0x50e   :  { %v1554_v21 = vpop.permute.xlu1 %1553  ;;  %v1592_v26 = vrot.slane %v1536_v3, %v3417_v8 }
 0x50f   :  { %v1616_v37 = vrot.slane %v1554_v21, %v3417_v8 }
 0x510   :  { %v1631_v43 = vsel %vm437_vm7, %v1592_v26, %v1630_v22 }
 0x511   :  { %v1636_v56 = vsel %vm433_vm5, %v1616_v37, %v1635_v47  ;;  %v1560_v55 = vpop.permute.xlu0 %1559  ;;  %v1641_v59 = vsel %vm448_vm8, %v1631_v43, 0.0 }
 0x512   :  { %v1557_v1 = vpop.permute.xlu1 %1556  ;;  %v1624_v57 = vrot.slane %v1560_v55, %v3417_v8  ;;  %1642 = vadd.xlane.f32.xlu1 %v1641_v59 }
 0x513   :  { %v1620_v4 = vrot.slane %v1557_v1, %v3417_v8 }
 0x515   :  { %v1637_v33 = vsel %vm435_vm6, %v1620_v4, %v1636_v56 }
 0x516   :  { %v1638_v60 = vsel %vm437_vm7, %v1624_v57, %v1637_v33 }
 0x517   :  { %v1644_v21 = vsel %vm448_vm8, %v1638_v60, 0.0 }
 0x518   :  { %1645 = vadd.xlane.f32.xlu0 %v1644_v21 }
 0x59b   :  { %v1643_v2 = vpop.xlane.xlu1 %1642 }
 0x59c   :  { %3117 = vrcp.f32 %v1643_v2  ;;  %v1106_v2 = vld [vmem:[%s4862_s3 + $0x8] sm:$0xff] }
 0x5a1   :  { %v1646_v40 = vpop.xlane.xlu0 %1645 }
 0x5a2   :  { %3119 = vrcp.f32 %v1646_v40 }
 0x5a9   :  { %v3118_v48 = vpop.eup %3117 }
 0x5aa   :  { %v1658_v14 = vrot.slane %v3118_v48, %v3478_v50  ;;  %v1654_v61 = vrot.slane %v3118_v48, %v3285_v17  ;;  %v1662_v7 = vrot.slane %v3118_v48, %v3481_v51  ;;  %v1666_v47 = vrot.slane %v3118_v48, %v3504_v24 }
 0x5ab   :  { %v1670_v22 = vrot.slane %v3118_v48, %v3518_v36  ;;  %v1674_v43 = vrot.slane %v3118_v48, %v3484_v52  ;;  %v1678_v59 = vrot.slane %v3118_v48, %v3487_v53  ;;  %v1682_v57 = vrot.slane %v3118_v48, %v3493_v9 }
 0x5ac   :  { %v1732_v37 = vmul.f32 %v4072_v62, %v1658_v14  ;;  %v1731_v19 = vmul.f32 %v4067_v12, %v1654_v61  ;;  %v1733_v18 = vmul.f32 %v4081_v54, %v1662_v7  ;;  %v1734_v12 = vmul.f32 %v4095_v45, %v1666_v47  ;;  %v1114_v14 = vld [vmem:[%s4862_s3 + $0x48] sm:$0xff]  ;;  %v1108_v61 = vld [vmem:[%s4862_s3 + $0x18] sm:$0xff] }
 0x5ad   :  { %v1736_v45 = vmul.f32 %v4107_v63, %v1674_v43  ;;  %v1738_v63 = vmul.f32 %v4119_v6, %v1682_v57  ;;  %v1107_v6 = vld [vmem:[%s4862_s3 + $0x10] sm:$0xff]  ;;  %v4246_v43 = vadd.f32 %v3942_v30, %v1114_v14 }
 0x5ae   :  { %1754 = vperm.xlu1 %3046, %v1732_v37   ;;  %1749 = vperm.xlu0 %3045, %v1731_v19   ;;  %v1115_v37 = vld [vmem:[%s4862_s3 + $0x50] sm:$0xff]  ;;  %v4221_v19 = vadd.f32 %v3942_v30, %v1106_v2 }
 0x5af   :  { %v3120_v3 = vpop.eup %3119 }
 0x5b0   :  { %v1686_v25 = vrot.slane %v3120_v3, %v3285_v17  ;;  %v1690_v1 = vrot.slane %v3120_v3, %v3478_v50  ;;  %v1694_v4 = vrot.slane %v3120_v3, %v3481_v51  ;;  %v1698_v56 = vrot.slane %v3120_v3, %v3504_v24 }
 0x5b1   :  { %v1702_v55 = vrot.slane %v3120_v3, %v3518_v36  ;;  %v1706_v33 = vrot.slane %v3120_v3, %v3484_v52  ;;  %v1710_v60 = vrot.slane %v3120_v3, %v3487_v53  ;;  %v1714_v21 = vrot.slane %v3120_v3, %v3493_v9 }
 0x5b2   :  { %v1739_v26 = vmul.f32 %v4087_v5, %v1686_v25  ;;  %1759 = vperm.xlu1 %3046, %v1733_v18   ;;  %v1740_v62 = vmul.f32 %v4090_v38, %v1690_v1  ;;  %v1741_v54 = vmul.f32 %v4097_v34, %v1694_v4  ;;  %v1735_v5 = vmul.f32 %v4101_v41, %v1670_v22  ;;  %v1109_v18 = vld [vmem:[%s4862_s3 + $0x20] sm:$0xff] }
 0x5b3   :  { %v1742_v38 = vmul.f32 %v4103_v20, %v1698_v56  ;;  %v1743_v34 = vmul.f32 %v4109_v15, %v1702_v55  ;;  %v1737_v41 = vmul.f32 %v4113_v46, %v1678_v59  ;;  %v1744_v20 = vmul.f32 %v4115_v44, %v1706_v33  ;;  %v1105_v44 = vld [vmem:[%s4862_s3] sm:$0xff]  ;;  %v1111_v33 = vld [vmem:[%s4862_s3 + $0x30] sm:$0xff] }
 0x5b4   :  { %1789 = vperm.xlu0 %3045, %v1739_v26   ;;  %v1745_v15 = vmul.f32 %v4121_v23, %v1710_v60  ;;  %v1746_v46 = vmul.f32 %v4125_v58, %v1714_v21  ;;  %v1113_v23 = vld [vmem:[%s4862_s3 + $0x40] sm:$0xff]  ;;  %v4224_v7 = vadd.f32 %v3942_v30, %v1105_v44  ;;  %v1116_v26 = vld [vmem:[%s4862_s3 + $0x58] sm:$0xff]  ;;  %v4253_v55 = vadd.f32 %v3942_v30, %v1108_v61  ;;  %v1118_v21 = vld [vmem:[%s4862_s3 + $0x68] sm:$0xff] }
 0x5b5   :  { %v4207_v58 = vld [vmem:[%s4865_s6] sm:$0xff]  ;;  %v4256_v59 = vadd.f32 %v3942_v30, %v1115_v37 }
 0x5b6   :  { %1794 = vperm.xlu1 %3046, %v1740_v62   ;;  %v1122_v40 = vadd.f32 %v4207_v58, %v1106_v2  ;;  %v1121_v48 = vadd.f32 %v4207_v58, %v1105_v44  ;;  %v1123_v3 = vadd.f32 %v4207_v58, %v1107_v6  ;;  %v1129_v25 = vadd.f32 %v4207_v58, %v1113_v23 }
 0x5b7   :  { %v4235_v62 = vadd.f32 %v3942_v30, %v1107_v6  ;;  %v1130_v4 = vadd.f32 %v4207_v58, %v1114_v14  ;;  %v1124_v22 = vadd.f32 %v4207_v58, %v1108_v61  ;;  %v4277_v6 = vadd.f32 %v3942_v30, %v1116_v26 }
 0x5b8   :  { %1764 = vperm.xlu0 %3045, %v1734_v12   ;;  %v4238_v12 = vadd.f32 %v3942_v30, %v1113_v23 }
 0x5ba   :  { %1799 = vperm.xlu1 %3046, %v1741_v54   ;;  %v1110_v54 = vld [vmem:[%s4862_s3 + $0x28] sm:$0xff] }
 0x5bb   :  { %v4271_v60 = vadd.f32 %v4207_v58, %v1110_v54  ;;  %v4286_v61 = vadd.f32 %v3942_v30, %v1110_v54  ;;  %v4305_v54 = vadd.f32 %v3942_v30, %v1111_v33 }
 0x5bc   :  { %1769 = vperm.xlu0 %3045, %v1735_v5  }
 0x5bd   :  { %4920 = vst [vmem:[#allocation21_spill] sm:$0xff] %v4305_v54 }
 0x5be   :  { %1804 = vperm.xlu1 %3046, %v1742_v38   ;;  %v1131_v38 = vadd.f32 %v4207_v58, %v1115_v37  ;;  %v4289_v37 = vadd.f32 %v4207_v58, %v1111_v33 }
 0x5c0   :  { %1774 = vperm.xlu0 %3045, %v1736_v45   ;;  %v1117_v45 = vld [vmem:[%s4862_s3 + $0x60] sm:$0xff] }
 0x5c1   :  { %v4280_v23 = vadd.f32 %v4207_v58, %v1117_v45 }
 0x5c2   :  { %1809 = vperm.xlu1 %3046, %v1743_v34   ;;  %v1125_v34 = vadd.f32 %v4207_v58, %v1109_v18 }
 0x5c4   :  { %1779 = vperm.xlu0 %3045, %v1737_v41   ;;  %v4260_v41 = vadd.f32 %v4207_v58, %v1116_v26  ;;  %v4292_v26 = vadd.f32 %v3942_v30, %v1117_v45 }
 0x5c6   :  { %1814 = vperm.xlu1 %3046, %v1744_v20   ;;  %4918 = vst [vmem:[#allocation19_spill] sm:$0xff] %v4292_v26 }
 0x5c8   :  { %1784 = vperm.xlu0 %3045, %v1738_v63   ;;  %v4268_v63 = vadd.f32 %v3942_v30, %v1109_v18 }
 0x5ca   :  { %1819 = vperm.xlu1 %3046, %v1745_v15  }
 0x5cc   :  { %1824 = vperm.xlu0 %3045, %v1746_v46  }
 0x629   :  { %v1755_v1 = vpop.permute.xlu1 %1754  ;;  %v1750_v47 = vpop.permute.xlu0 %1749 }
 0x62a   :  { %v1828_v5 = vmul.f32 %v1755_v1, %v1122_v40  ;;  %v1827_v56 = vmul.f32 %v1750_v47, %v1121_v48  ;;  %v1112_v40 = vld [vmem:[%s4862_s3 + $0x38] sm:$0xff]  ;;  %v4295_v47 = vadd.f32 %v4207_v58, %v1118_v21 }
 0x62b   :  { %v4325_v8 = vadd.f32 %v3942_v30, %v1112_v40 }
 0x62c   :  { %v1850_v57 = vsel %vm294_vm0, %v1828_v5, 0.0  ;;  %v1843_v20 = vsel %vm294_vm0, %v1827_v56, 0.0  ;;  %v4300_v5 = vld [vmem:[%s4862_s3 + $0x70] sm:$0xff]  ;;  %v4308_v56 = vadd.f32 %v4207_v58, %v1112_v40 }
 0x62d   :  { %v1851_v15 = vrot.slane %v1850_v57, 4  ;;  %v1844_v46 = vrot.slane %v1843_v20, 4  ;;  %v1760_v2 = vpop.permute.xlu1 %1759  ;;  %4919 = vst [vmem:[#allocation20_spill] sm:$0xff] %v4300_v5  ;;  %v4320_v33 = vadd.f32 %v4207_v58, %v4300_v5  ;;  %4923 = vst [vmem:[#allocation24_spill] sm:$0xff] %v4325_v8 }
 0x62e   :  { %v1829_v48 = vmul.f32 %v1760_v2, %v1123_v3 }
 0x62f   :  { %v1790_v44 = vpop.permute.xlu0 %1789  ;;  %v1852_v18 = vadd.f32 %v1851_v15, %v1850_v57  ;;  %v1845_v1 = vadd.f32 %v1844_v46, %v1843_v20 }
 0x630   :  { %v1835_v14 = vmul.f32 %v1790_v44, %v1129_v25  ;;  %v1857_v3 = vsel %vm294_vm0, %v1829_v48, 0.0  ;;  %v4313_v44 = vld [vmem:[%s4862_s3 + $0x78] sm:$0xff] }
 0x631   :  { %v1853_v45 = vrot.slane %v1852_v18, 2  ;;  %v1846_v57 = vrot.slane %v1845_v1, 2  ;;  %v1858_v20 = vrot.slane %v1857_v3, 4  ;;  %v1795_v46 = vpop.permute.xlu1 %1794  ;;  %4921 = vst [vmem:[#allocation22_spill] sm:$0xff] %v4313_v44 }
 0x632   :  { %v1899_v25 = vsel %vm294_vm0, %v1835_v14, 0.0  ;;  %v1836_v48 = vmul.f32 %v1795_v46, %v1130_v4  ;;  %v4316_v14 = vadd.f32 %v3942_v30, %v1118_v21  ;;  %v4329_v4 = vadd.f32 %v4207_v58, %v4313_v44 }
 0x633   :  { %v1900_v15 = vrot.slane %v1899_v25, 4  ;;  %v1765_v2 = vpop.permute.xlu0 %1764  ;;  %v1854_v53 = vadd.f32 %v1853_v45, %v1852_v18  ;;  %v1847_v52 = vadd.f32 %v1846_v57, %v1845_v1  ;;  %v1859_v36 = vadd.f32 %v1858_v20, %v1857_v3 }
 0x634   :  { %v1830_v9 = vmul.f32 %v1765_v2, %v1124_v22  ;;  %4922 = vst [vmem:[#allocation23_spill] sm:$0xff] %v4316_v14  ;;  %v1906_v51 = vsel %vm294_vm0, %v1836_v48, 0.0 }
 0x635   :  { %v1901_v24 = vadd.f32 %v1900_v15, %v1899_v25  ;;  %v1855_v22 = vrot.slane %v1854_v53, 1  ;;  %v1848_v21 = vrot.slane %v1847_v52, 1  ;;  %v1860_v46 = vrot.slane %v1859_v36, 2  ;;  %v1800_v14 = vpop.permute.xlu1 %1799 }
 0x636   :  { %v1864_v50 = vsel %vm294_vm0, %v1830_v9, 0.0  ;;  %v1907_v1 = vrot.slane %v1906_v51, 4  ;;  %v1837_v25 = vmul.f32 %v1800_v14, %v1131_v38 }
 0x637   :  { %v1902_v2 = vrot.slane %v1901_v24, 2  ;;  %v1770_v18 = vpop.permute.xlu0 %1769  ;;  %v1865_v3 = vrot.slane %v1864_v50, 4  ;;  %v1856_v57 = vadd.f32 %v1855_v22, %v1854_v53  ;;  %v1849_v20 = vadd.f32 %v1848_v21, %v1847_v52 }
 0x638   :  { %v1831_v45 = vmul.f32 %v1770_v18, %v1125_v34  ;;  %v1861_v9 = vadd.f32 %v1860_v46, %v1859_v36  ;;  %v1908_v30 = vadd.f32 %v1907_v1, %v1906_v51  ;;  %v1913_v48 = vsel %vm294_vm0, %v1837_v25, 0.0 }
 0x639   :  { %v1903_v15 = vadd.f32 %v1902_v2, %v1901_v24  ;;  %v1866_v40 = vadd.f32 %v1865_v3, %v1864_v50  ;;  %v1914_v5 = vrot.slane %v1913_v48, 4  ;;  %v1805_v29 = vpop.permute.xlu1 %1804 }
 0x63a   :  { %v1871_v58 = vsel %vm294_vm0, %v1831_v45, 0.0  ;;  %v1862_v8 = vrot.slane %v1861_v9, 1  ;;  %v1909_v26 = vrot.slane %v1908_v30, 2  ;;  %v1838_v38 = vmul.f32 %v1805_v29, %v4260_v41 }
 0x63b   :  { %v1904_v44 = vrot.slane %v1903_v15, 1  ;;  %v1872_v54 = vrot.slane %v1871_v58, 4  ;;  %v1775_v32 = vpop.permute.xlu0 %1774  ;;  %v1867_v49 = vrot.slane %v1866_v40, 2  ;;  %v1915_v50 = vadd.f32 %v1914_v5, %v1913_v48 }
 0x63c   :  { %v1832_v52 = vmul.f32 %v1775_v32, %v4271_v60  ;;  %v4335_v53 = vadd.f32 %v1862_v8, %v1861_v9  ;;  %v1910_v36 = vadd.f32 %v1909_v26, %v1908_v30  ;;  %v1920_v14 = vsel %vm294_vm0, %v1838_v38, 0.0 }
 0x63d   :  { %v4337_v51 = vadd.f32 %v1904_v44, %v1903_v15  ;;  %v1873_v24 = vadd.f32 %v1872_v54, %v1871_v58  ;;  %v1868_v34 = vadd.f32 %v1867_v49, %v1866_v40  ;;  %v1916_v21 = vrot.slane %v1915_v50, 2  ;;  %v1810_v1 = vpop.permute.xlu1 %1809 }
 0x63e   :  { %v1878_v22 = vsel %vm294_vm0, %v1832_v52, 0.0  ;;  %v1921_v2 = vrot.slane %v1920_v14, 4  ;;  %v1911_v41 = vrot.slane %v1910_v36, 1  ;;  %v1839_v8 = vmul.f32 %v1810_v1, %v4280_v23 }
 0x63f   :  { %v1874_v46 = vrot.slane %v1873_v24, 2  ;;  %v1879_v18 = vrot.slane %v1878_v22, 4  ;;  %v1780_v29 = vpop.permute.xlu0 %1779  ;;  %v1869_v32 = vrot.slane %v1868_v34, 1  ;;  %v1917_v5 = vadd.f32 %v1916_v21, %v1915_v50 }
 0x640   :  { %v1833_v60 = vmul.f32 %v1780_v29, %v4289_v37  ;;  %v1922_v26 = vadd.f32 %v1921_v2, %v1920_v14  ;;  %v4343_v44 = vadd.f32 %v1911_v41, %v1910_v36  ;;  %v1927_v25 = vsel %vm294_vm0, %v1839_v8, 0.0 }
 0x641   :  { %v1875_v54 = vadd.f32 %v1874_v46, %v1873_v24  ;;  %v1880_v49 = vadd.f32 %v1879_v18, %v1878_v22  ;;  %v4345_v3 = vadd.f32 %v1869_v32, %v1868_v34  ;;  %v1918_v9 = vrot.slane %v1917_v5, 1  ;;  %v1815_v48 = vpop.permute.xlu1 %1814 }
 0x642   :  { %v1885_v45 = vsel %vm294_vm0, %v1833_v60, 0.0  ;;  %v1923_v30 = vrot.slane %v1922_v26, 2  ;;  %v1928_v58 = vrot.slane %v1927_v25, 4  ;;  %v4350_v38 = vadd.f32 %v1856_v57, %v3788_v35 }
 0x643   :  { %v1876_v15 = vrot.slane %v1875_v54, 1  ;;  %v1881_v40 = vrot.slane %v1880_v49, 2  ;;  %v1785_v23 = vpop.permute.xlu0 %1784  ;;  %v1886_v37 = vrot.slane %v1885_v45, 4  ;;  %v4353_v52 = vadd.f32 %v1849_v20, %v3791_v27 }
 0x644   :  { %v4355_v50 = vadd.f32 %v1918_v9, %v1917_v5  ;;  %v1924_v36 = vadd.f32 %v1923_v30, %v1922_v26  ;;  %v1929_v14 = vadd.f32 %v1928_v58, %v1927_v25  ;;  %v2026_v21 = vrot.slane %v4350_v38, %v3285_v17  ;;  %v4924_v25 = vld [vmem:[#allocation14_spill] sm:$0xff] }
 0x645   :  { %v4357_v24 = vadd.f32 %v1876_v15, %v1875_v54  ;;  %v1882_v34 = vadd.f32 %v1881_v40, %v1880_v49  ;;  %v1887_v22 = vadd.f32 %v1886_v37, %v1885_v45  ;;  %v2022_v46 = vrot.slane %v4353_v52, %v3285_v17  ;;  %v1820_v41 = vpop.permute.xlu1 %1819 }
 0x646   :  { %v1925_v2 = vrot.slane %v1924_v36, 1  ;;  %v1840_v57 = vmul.f32 %v1815_v48, %v4295_v47  ;;  %v1834_v27 = vmul.f32 %v1785_v23, %v4308_v56  ;;  %v1930_v20 = vrot.slane %v1929_v14, 2 }
 0x647   :  { %v1883_v35 = vrot.slane %v1882_v34, 1  ;;  %v1888_v18 = vrot.slane %v1887_v22, 2  ;;  %v2084_v1 = vmul.f32 %v2026_v21, %v4221_v19  ;;  %v2083_v29 = vmul.f32 %v2022_v46, %v4224_v7  ;;  %v1825_v54 = vpop.permute.xlu0 %1824 }
 0x648   :  { %v4367_v32 = vadd.f32 %v1925_v2, %v1924_v36  ;;  %v1934_v60 = vsel %vm294_vm0, %v1840_v57, 0.0  ;;  %v1892_v5 = vsel %vm294_vm0, %v1834_v27, 0.0  ;;  %v1931_v26 = vadd.f32 %v1930_v20, %v1929_v14 }
 0x649   :  { %v4369_v8 = vadd.f32 %v1883_v35, %v1882_v34  ;;  %v1889_v47 = vadd.f32 %v1888_v18, %v1887_v22  ;;  %v2102_v56 = vsel %vm294_vm0, %v2084_v1, 0.0  ;;  %v2099_v49 = vsel %vm294_vm0, %v2083_v29, 0.0  ;;  %v4925_v35 = vld [vmem:[#allocation15_spill] sm:$0xff] }
 0x64a   :  { %2103 = vadd.xlane.f32.xlu0 %v2102_v56  ;;  %2100 = vadd.xlane.f32.xlu1 %v2099_v49  ;;  %v1935_v19 = vrot.slane %v1934_v60, 4  ;;  %v1893_v7 = vrot.slane %v1892_v5, 4  ;;  %v4377_v45 = vadd.f32 %v4335_v53, %v4924_v25  ;;  %v1841_v9 = vmul.f32 %v1820_v41, %v4320_v33 }
 0x64b   :  { %v1932_v15 = vrot.slane %v1931_v26, 1  ;;  %v1890_v30 = vrot.slane %v1889_v47, 1  ;;  %v4382_v40 = vadd.f32 %v4337_v51, %v3861_v0  ;;  %v1842_v48 = vmul.f32 %v1825_v54, %v4329_v4 }
 0x64c   :  { %v1936_v23 = vadd.f32 %v1935_v19, %v1934_v60  ;;  %v1894_v58 = vadd.f32 %v1893_v7, %v1892_v5  ;;  %v2030_v37 = vrot.slane %v4377_v45, %v3285_v17  ;;  %v1941_v36 = vsel %vm294_vm0, %v1841_v9, 0.0 }
 0x64d   :  { %v1933_v34 = vadd.f32 %v1932_v15, %v1931_v26  ;;  %v1891_v53 = vadd.f32 %v1890_v30, %v1889_v47  ;;  %v1942_v14 = vrot.slane %v1941_v36, 4  ;;  %v2054_v33 = vrot.slane %v4382_v40, %v3285_v17 }
 0x64e   :  { %v1937_v22 = vrot.slane %v1936_v23, 2  ;;  %v1895_v21 = vrot.slane %v1894_v58, 2  ;;  %v2085_v0 = vmul.f32 %v2030_v37, %v4235_v62  ;;  %v1948_v51 = vsel %vm294_vm0, %v1842_v48, 0.0 }
 0x64f   :  { %v1943_v4 = vadd.f32 %v1942_v14, %v1941_v36  ;;  %v2091_v46 = vmul.f32 %v2054_v33, %v4238_v12  ;;  %v1949_v2 = vrot.slane %v1948_v51, 4  ;;  %v4395_v57 = vadd.f32 %v4343_v44, %v4925_v35  ;;  %v4926_v14 = vld [vmem:[#allocation17_spill] sm:$0xff]  ;;  %v3169_v35 = vld [vmem:[%s4864_s5] sm:$0xff] }
 0x650   :  { %v1938_v27 = vadd.f32 %v1937_v22, %v1936_v23  ;;  %v1896_v20 = vadd.f32 %v1895_v21, %v1894_v58  ;;  %v2105_v18 = vsel %vm294_vm0, %v2085_v0, 0.0  ;;  %v4400_v1 = vadd.f32 %v4345_v3, %v3883_v31  ;;  %v4928_v21 = vld [vmem:[#allocation16_spill] sm:$0xff]  ;;  %v4929_v0 = vld [vmem:[#allocation18_spill] sm:$0xff] }
 0x651   :  { %2106 = vadd.xlane.f32.xlu0 %v2105_v18  ;;  %v1944_v62 = vrot.slane %v1943_v4, 2  ;;  %v2123_v29 = vsel %vm294_vm0, %v2091_v46, 0.0  ;;  %v1950_v41 = vadd.f32 %v1949_v2, %v1948_v51  ;;  %v2058_v12 = vrot.slane %v4395_v57, %v3285_v17 }
 0x652   :  { %v1939_v60 = vrot.slane %v1938_v27, 1  ;;  %v1897_v5 = vrot.slane %v1896_v20, 1  ;;  %2124 = vadd.xlane.f32.xlu1 %v2123_v29  ;;  %v2034_v44 = vrot.slane %v4400_v1, %v3285_v17  ;;  %v4409_v54 = vadd.f32 %v4355_v50, %v3874_v16 }
 0x653   :  { %v1945_v31 = vadd.f32 %v1944_v62, %v1943_v4  ;;  %v1951_v3 = vrot.slane %v1950_v41, 2  ;;  %v2092_v26 = vmul.f32 %v2058_v12, %v4246_v43  ;;  %v4414_v47 = vadd.f32 %v4357_v24, %v3892_v42  ;;  %v4930_v4 = vld [vmem:[#allocation21_spill] sm:$0xff]  ;;  %v4932_v62 = vld [vmem:[#allocation23_spill] sm:$0xff]  ;;  %v4933_v12 = vld [vmem:[#allocation22_spill] sm:$0xff] }
 0x654   :  { %v1940_v56 = vadd.f32 %v1939_v60, %v1938_v27  ;;  %v1898_v49 = vadd.f32 %v1897_v5, %v1896_v20  ;;  %v2086_v19 = vmul.f32 %v2034_v44, %v4253_v55  ;;  %v2062_v7 = vrot.slane %v4409_v54, %v3285_v17  ;;  %v4931_v27 = vld [vmem:[#allocation20_spill] sm:$0xff] }
 0x655   :  { %v1946_v25 = vrot.slane %v1945_v31, 1  ;;  %v1952_v9 = vadd.f32 %v1951_v3, %v1950_v41  ;;  %v2126_v16 = vsel %vm294_vm0, %v2092_v26, 0.0  ;;  %v2038_v50 = vrot.slane %v4414_v47, %v3285_v17  ;;  %v4934_v44 = vld [vmem:[#allocation24_spill] sm:$0xff] }
 0x656   :  { %2127 = vadd.xlane.f32.xlu0 %v2126_v16  ;;  %v2108_v43 = vsel %vm294_vm0, %v2086_v19, 0.0  ;;  %v2093_v42 = vmul.f32 %v2062_v7, %v4256_v59  ;;  %v4426_v24 = vadd.f32 %v4367_v32, %v3887_v39  ;;  %v4430_v55 = vadd.f32 %v4369_v8, %v3911_v28 }
 0x657   :  { %v1947_v15 = vadd.f32 %v1946_v25, %v1945_v31  ;;  %v1953_v30 = vrot.slane %v1952_v9, 1  ;;  %2109 = vadd.xlane.f32.xlu1 %v2108_v43  ;;  %v2087_v48 = vmul.f32 %v2038_v50, %v4268_v63  ;;  %v4434_v23 = vadd.f32 %v1933_v34, %v3896_v13 }
 0x658   :  { %v2129_v58 = vsel %vm294_vm0, %v2093_v42, 0.0  ;;  %v2066_v59 = vrot.slane %v4426_v24, %v3285_v17  ;;  %v2042_v39 = vrot.slane %v4430_v55, %v3285_v17  ;;  %v4442_v32 = vadd.f32 %v1891_v53, %v3926_v10  ;;  %v4927_v53 = vld [vmem:[#allocation19_spill] sm:$0xff] }
 0x659   :  { %v1954_v28 = vadd.f32 %v1953_v30, %v1952_v9  ;;  %v2111_v8 = vsel %vm294_vm0, %v2087_v48, 0.0  ;;  %v2070_v63 = vrot.slane %v4434_v23, %v3285_v17  ;;  %v4448_v13 = vadd.f32 %v1940_v56, %v3921_v11 }
 0x65a   :  { %2130 = vadd.xlane.f32.xlu0 %v2129_v58  ;;  %v2094_v37 = vmul.f32 %v2066_v59, %v4277_v6  ;;  %v2088_v36 = vmul.f32 %v2042_v39, %v4286_v61  ;;  %v2046_v34 = vrot.slane %v4442_v32, %v3285_v17  ;;  %v4455_v10 = vadd.f32 %v1898_v49, %v4926_v14  ;;  %v4935_v39 = vld [vmem:[#allocation6_spill] sm:$0xff] }
 0x65b   :  { %2112 = vadd.xlane.f32.xlu1 %v2111_v8  ;;  %v2095_v33 = vmul.f32 %v2070_v63, %v4927_v53  ;;  %v2074_v22 = vrot.slane %v4448_v13, %v3285_v17  ;;  %v4461_v11 = vadd.f32 %v1947_v15, %v4928_v21  ;;  %v4464_v51 = vadd.f32 %v1954_v28, %v4929_v0 }
 0x65c   :  { %v2132_v6 = vsel %vm294_vm0, %v2094_v37, 0.0  ;;  %v2114_v61 = vsel %vm294_vm0, %v2088_v36, 0.0  ;;  %v2089_v46 = vmul.f32 %v2046_v34, %v4930_v4  ;;  %v2050_v2 = vrot.slane %v4455_v10, %v3285_v17 }
 0x65d   :  { %v1985_v20 = vadd.f32 %v3169_v35, %v4931_v27  ;;  %v2135_v18 = vsel %vm294_vm0, %v2095_v33, 0.0  ;;  %v2096_v29 = vmul.f32 %v2074_v22, %v4932_v62  ;;  %v2078_v41 = vrot.slane %v4461_v11, %v3285_v17 }
 0x65e   :  { %2133 = vadd.xlane.f32.xlu0 %v2132_v6  ;;  %v1986_v60 = vadd.f32 %v3169_v35, %v4933_v12  ;;  %v2117_v5 = vsel %vm294_vm0, %v2089_v46, 0.0  ;;  %v2090_v31 = vmul.f32 %v2050_v2, %v4934_v44  ;;  %v2082_v3 = vrot.slane %v4464_v51, %v3285_v17 }
 0x65f   :  { %2115 = vadd.xlane.f32.xlu1 %v2114_v61  ;;  %v2138_v26 = vsel %vm294_vm0, %v2096_v29, 0.0  ;;  %v2097_v56 = vmul.f32 %v2078_v41, %v1985_v20 }
 0x660   :  { %v2120_v49 = vsel %vm294_vm0, %v2090_v31, 0.0  ;;  %v2098_v19 = vmul.f32 %v2082_v3, %v1986_v60 }
 0x661   :  { %v2141_v7 = vsel %vm294_vm0, %v2097_v56, 0.0 }
 0x662   :  { %2136 = vadd.xlane.f32.xlu0 %v2135_v18  ;;  %v2144_v25 = vsel %vm294_vm0, %v2098_v19, 0.0 }
 0x663   :  { %2118 = vadd.xlane.f32.xlu1 %v2117_v5 }
 0x666   :  { %2139 = vadd.xlane.f32.xlu0 %v2138_v26 }
 0x667   :  { %2121 = vadd.xlane.f32.xlu1 %v2120_v49 }
 0x66a   :  { %2142 = vadd.xlane.f32.xlu0 %v2141_v7 }
 0x66b   :  { %2145 = vadd.xlane.f32.xlu1 %v2144_v25 }
 0x6d3   :  { %v2104_v9 = vpop.xlane.xlu0 %2103  ;;  %v2101_v16 = vpop.xlane.xlu1 %2100 }
 0x6d4   :  { %v2166_v28 = vrot.slane %v2101_v16, %v4935_v39  ;;  %v2170_v8 = vrot.slane %v2104_v9, %v4935_v39 }
 0x6d6   :  { %v2227_v53 = vsel %vm425_vm1, %v2170_v8, %v2166_v28 }
 0x6da   :  { %v2107_v50 = vpop.xlane.xlu0 %2106 }
 0x6db   :  { %v4488_v43 = vpop.xlane.xlu1 %2124  ;;  %v2174_v63 = vrot.slane %v2107_v50, %v4935_v39 }
 0x6dc   :  { %v2198_v61 = vrot.slane %v4488_v43, %v4935_v39 }
 0x6dd   :  { %v2228_v21 = vsel %vm427_vm2, %v2174_v63, %v2227_v53 }
 0x6df   :  { %v4490_v42 = vpop.xlane.xlu0 %2127 }
 0x6e0   :  { %v4492_v15 = vpop.xlane.xlu1 %2109  ;;  %v2202_v33 = vrot.slane %v4490_v42, %v4935_v39 }
 0x6e1   :  { %v2178_v37 = vrot.slane %v4492_v15, %v4935_v39 }
 0x6e2   :  { %v2234_v18 = vsel %vm425_vm1, %v2202_v33, %v2198_v61  ;;  %v4937_v33 = vld [vmem:[#allocation8_spill] sm:$0xff] }
 0x6e3   :  { %v4494_v30 = vpop.xlane.xlu0 %2130  ;;  %v2229_v4 = vsel %vm429_vm3, %v2178_v37, %v2228_v21 }
 0x6e4   :  { %v4496_v48 = vpop.xlane.xlu1 %2112  ;;  %v2206_v0 = vrot.slane %v4494_v30, %v4935_v39 }
 0x6e5   :  { %v2182_v34 = vrot.slane %v4496_v48, %v4935_v39 }
 0x6e6   :  { %v2235_v12 = vsel %vm427_vm2, %v2206_v0, %v2234_v18  ;;  %v4938_v18 = vld [vmem:[#allocation12_spill] sm:$0xff] }
 0x6e7   :  { %v4498_v58 = vpop.xlane.xlu0 %2133  ;;  %v2230_v35 = vsel %vm431_vm4, %v2182_v34, %v2229_v4  ;;  %v4936_v34 = vld [vmem:[#allocation7_spill] sm:$0xff] }
 0x6e8   :  { %v4500_v59 = vpop.xlane.xlu1 %2115  ;;  %v2210_v46 = vrot.slane %v4498_v58, %v4935_v39 }
 0x6e9   :  { %v2186_v22 = vrot.slane %v4500_v59, %v4935_v39 }
 0x6ea   :  { %v2236_v5 = vsel %vm429_vm3, %v2210_v46, %v2235_v12 }
 0x6eb   :  { %v4507_v36 = vpop.xlane.xlu0 %2136  ;;  %v2231_v62 = vsel %vm433_vm5, %v2186_v22, %v2230_v35 }
 0x6ec   :  { %v4511_v14 = vpop.xlane.xlu1 %2118  ;;  %v2214_v27 = vrot.slane %v4507_v36, %v4935_v39 }
 0x6ed   :  { %v2190_v6 = vrot.slane %v4511_v14, %v4935_v39 }
 0x6ee   :  { %v2237_v3 = vsel %vm431_vm4, %v2214_v27, %v2236_v5 }
 0x6ef   :  { %v4528_v2 = vpop.xlane.xlu0 %2139  ;;  %v2232_v60 = vsel %vm435_vm6, %v2190_v6, %v2231_v62 }
 0x6f0   :  { %v4533_v20 = vpop.xlane.xlu1 %2121  ;;  %v2218_v29 = vrot.slane %v4528_v2, %v4935_v39 }
 0x6f1   :  { %v2194_v41 = vrot.slane %v4533_v20, %v4935_v39 }
 0x6f2   :  { %v2238_v19 = vsel %vm433_vm5, %v2218_v29, %v2237_v3 }
 0x6f3   :  { %v4544_v44 = vpop.xlane.xlu0 %2142  ;;  %v2233_v31 = vsel %vm437_vm7, %v2194_v41, %v2232_v60  ;;  %v4939_v41 = vld [vmem:[#allocation13_spill] sm:$0xff] }
 0x6f4   :  { %v2222_v26 = vrot.slane %v4544_v44, %v4935_v39  ;;  %v4550_v56 = vpop.xlane.xlu1 %2145  ;;  %v2243_v49 = vsel %vm448_vm8, %v2233_v31, -inf }
 0x6f5   :  { %v2226_v7 = vrot.slane %v4550_v56, %v4935_v39  ;;  %2244 = vmax.xlane.f32.xlu0 %v2243_v49  ;;  %v4940_v49 = vld [vmem:[#allocation9_spill] sm:$0xff] }
 0x6f6   :  { %v2239_v25 = vsel %vm435_vm6, %v2222_v26, %v2238_v19 }
 0x6f7   :  { %v2240_v28 = vsel %vm437_vm7, %v2226_v7, %v2239_v25 }
 0x6f8   :  { %v2246_v8 = vsel %vm448_vm8, %v2240_v28, -inf  ;;  %v4941_v28 = vld [vmem:[#allocation10_spill] sm:$0xff] }
 0x6f9   :  { %2247 = vmax.xlane.f32.xlu1 %v2246_v8 }
 0x77e   :  { %v2245_v63 = vpop.xlane.xlu0 %2244 }
 0x77f   :  { %v2254_v37 = vrot.slane %v2245_v63, %v3285_v17  ;;  %v2258_v53 = vrot.slane %v2245_v63, %v4936_v34  ;;  %v2262_v22 = vrot.slane %v2245_v63, %v4937_v33  ;;  %v2266_v62 = vrot.slane %v2245_v63, %v4938_v18 }
 0x780   :  { %v2270_v12 = vrot.slane %v2245_v63, %v4939_v41  ;;  %v2274_v19 = vrot.slane %v2245_v63, %v4940_v49  ;;  %v2278_v8 = vrot.slane %v2245_v63, %v4941_v28 }
 0x781   :  { %v2331_v21 = vsub.f32 %v2101_v16, %v2254_v37  ;;  %v2332_v0 = vsub.f32 %v2104_v9, %v2258_v53  ;;  %v2333_v6 = vsub.f32 %v2107_v50, %v2262_v22  ;;  %v2334_v60 = vsub.f32 %v4492_v15, %v2266_v62 }
 0x782   :  { %v4562_v61 = vpop.xlane.xlu1 %2247  ;;  %v2335_v7 = vsub.f32 %v4496_v48, %v2270_v12  ;;  %v2336_v37 = vsub.f32 %v4500_v59, %v2274_v19  ;;  %v2337_v59 = vsub.f32 %v4511_v14, %v2278_v8 }
 0x783   :  { %v2347_v4 = vmul.f32 1.442695, %v2331_v21  ;;  %v2349_v46 = vmul.f32 1.442695, %v2332_v0  ;;  %v2286_v35 = vrot.slane %v4562_v61, %v3285_v17  ;;  %v2290_v27 = vrot.slane %v4562_v61, %v4936_v34 }
 0x784   :  { %v2351_v29 = vmul.f32 1.442695, %v2333_v6  ;;  %v2294_v16 = vrot.slane %v4562_v61, %v4937_v33  ;;  %v2298_v5 = vrot.slane %v4562_v61, %v4938_v18  ;;  %v2353_v25 = vmul.f32 1.442695, %v2334_v60 }
 0x785   :  { %3121 = vpow2.f32 %v2347_v4  ;;  %v2339_v9 = vsub.f32 %v4488_v43, %v2286_v35  ;;  %v2340_v50 = vsub.f32 %v4490_v42, %v2290_v27  ;;  %v2302_v43 = vrot.slane %v4562_v61, %v4939_v41 }
 0x786   :  { %3123 = vpow2.f32 %v2349_v46  ;;  %v2341_v31 = vsub.f32 %v4494_v30, %v2294_v16  ;;  %v2342_v42 = vsub.f32 %v4498_v58, %v2298_v5  ;;  %v2355_v30 = vmul.f32 1.442695, %v2335_v7  ;;  %v4942_v58 = vld [vmem:[#allocation11_spill] sm:$0xff] }
 0x787   :  { %3125 = vpow2.f32 %v2351_v29  ;;  %v2363_v3 = vmul.f32 1.442695, %v2339_v9  ;;  %v2365_v26 = vmul.f32 1.442695, %v2340_v50  ;;  %v2306_v48 = vrot.slane %v4562_v61, %v4940_v49 }
 0x788   :  { %v2367_v15 = vmul.f32 1.442695, %v2341_v31  ;;  %v2343_v22 = vsub.f32 %v4507_v36, %v2302_v43  ;;  %v2369_v21 = vmul.f32 1.442695, %v2342_v42  ;;  %v2282_v6 = vrot.slane %v2245_v63, %v4942_v58 }
 0x789   :  { %3127 = vpow2.f32 %v2363_v3  ;;  %v2357_v4 = vmul.f32 1.442695, %v2336_v37  ;;  %v2310_v46 = vrot.slane %v4562_v61, %v4941_v28  ;;  %v2344_v35 = vsub.f32 %v4528_v2, %v2306_v48 }
 0x78a   :  { %3129 = vpow2.f32 %v2365_v26  ;;  %v2371_v36 = vmul.f32 1.442695, %v2343_v22  ;;  %v2338_v62 = vsub.f32 %v4533_v20, %v2282_v6  ;;  %v2359_v29 = vmul.f32 1.442695, %v2337_v59 }
 0x78b   :  { %3131 = vpow2.f32 %v2353_v25  ;;  %v2314_v14 = vrot.slane %v4562_v61, %v4942_v58  ;;  %v2345_v16 = vsub.f32 %v4544_v44, %v2310_v46  ;;  %v2373_v9 = vmul.f32 1.442695, %v2344_v35 }
 0x78c   :  { %3133 = vpow2.f32 %v2367_v15  ;;  %v2361_v50 = vmul.f32 1.442695, %v2338_v62 }
 0x78d   :  { %3135 = vpow2.f32 %v2355_v30  ;;  %v2346_v20 = vsub.f32 %v4550_v56, %v2314_v14  ;;  %v2375_v61 = vmul.f32 1.442695, %v2345_v16 }
 0x78e   :  { %3137 = vpow2.f32 %v2369_v21 }
 0x78f   :  { %3139 = vpow2.f32 %v2357_v4  ;;  %v2377_v44 = vmul.f32 1.442695, %v2346_v20 }
 0x790   :  { %3141 = vpow2.f32 %v2371_v36 }
 0x791   :  { %3143 = vpow2.f32 %v2359_v29 }
 0x792   :  { %v4585_v53 = vpop.eup %3121  ;;  %3145 = vpow2.f32 %v2373_v9 }
 0x793   :  { %v4590_v0 = vpop.eup %3123  ;;  %2396 = vperm.xlu0 %3045, %v4585_v53   ;;  %3147 = vpow2.f32 %v2361_v50 }
 0x794   :  { %2399 = vperm.xlu1 %3046, %v4590_v0   ;;  %v4599_v27 = vpop.eup %3125  ;;  %3149 = vpow2.f32 %v2375_v61 }
 0x795   :  { %3151 = vpow2.f32 %v2377_v44 }
 0x796   :  { %v4605_v63 = vpop.eup %3127 }
 0x797   :  { %v4608_v2 = vpop.eup %3129  ;;  %2420 = vperm.xlu0 %3045, %v4605_v63  }
 0x798   :  { %2402 = vperm.xlu1 %3046, %v4599_v27   ;;  %v4613_v12 = vpop.eup %3131 }
 0x799   :  { %v4615_v60 = vpop.eup %3133 }
 0x79a   :  { %v4619_v5 = vpop.eup %3135 }
 0x79b   :  { %2405 = vperm.xlu0 %3045, %v4613_v12   ;;  %v4621_v31 = vpop.eup %3137 }
 0x79c   :  { %2423 = vperm.xlu1 %3046, %v4608_v2   ;;  %v4625_v56 = vpop.eup %3139 }
 0x79d   :  { %v4627_v3 = vpop.eup %3141 }
 0x79e   :  { %v4631_v26 = vpop.eup %3143 }
 0x79f   :  { %2408 = vperm.xlu0 %3045, %v4619_v5   ;;  %v4633_v19 = vpop.eup %3145 }
 0x7a0   :  { %2426 = vperm.xlu1 %3046, %v4615_v60   ;;  %v4637_v7 = vpop.eup %3147 }
 0x7a1   :  { %v4639_v25 = vpop.eup %3149 }
 0x7a2   :  { %v4643_v43 = vpop.eup %3151 }
 0x7a3   :  { %2411 = vperm.xlu0 %3045, %v4625_v56  }
 0x7a4   :  { %2429 = vperm.xlu1 %3046, %v4621_v31  }
 0x7a7   :  { %2414 = vperm.xlu0 %3045, %v4631_v26  }
 0x7a8   :  { %2432 = vperm.xlu1 %3046, %v4627_v3  }
 0x7ab   :  { %2417 = vperm.xlu0 %3045, %v4637_v7  }
 0x7ac   :  { %2435 = vperm.xlu1 %3046, %v4633_v19  }
 0x7af   :  { %2441 = vperm.xlu0 %3045, %v4643_v43  }
 0x7b0   :  { %2438 = vperm.xlu1 %3046, %v4639_v25  }
 0x80e   :  { %v2397_v15 = vpop.permute.xlu0 %2396 }
 0x80f   :  { %v2400_v42 = vpop.permute.xlu1 %2399  ;;  %v2446_v46 = vrot.slane %v2397_v15, %v4935_v39 }
 0x810   :  { %v2450_v4 = vrot.slane %v2400_v42, %v4935_v39 }
 0x812   :  { %v2421_v37 = vpop.permute.xlu0 %2420  ;;  %v2507_v50 = vsel %vm425_vm1, %v2450_v4, %v2446_v46 }
 0x813   :  { %v2403_v8 = vpop.permute.xlu1 %2402  ;;  %v2478_v20 = vrot.slane %v2421_v37, %v4935_v39 }
 0x814   :  { %v2454_v36 = vrot.slane %v2403_v8, %v4935_v39 }
 0x816   :  { %v2406_v48 = vpop.permute.xlu0 %2405  ;;  %v2508_v15 = vsel %vm427_vm2, %v2454_v36, %v2507_v50 }
 0x817   :  { %v2424_v30 = vpop.permute.xlu1 %2423  ;;  %v2458_v29 = vrot.slane %v2406_v48, %v4935_v39 }
 0x818   :  { %v2482_v62 = vrot.slane %v2424_v30, %v4935_v39 }
 0x81a   :  { %v2409_v21 = vpop.permute.xlu0 %2408  ;;  %v2514_v48 = vsel %vm425_vm1, %v2482_v62, %v2478_v20 }
 0x81b   :  { %v2427_v22 = vpop.permute.xlu1 %2426  ;;  %v2462_v16 = vrot.slane %v2409_v21, %v4935_v39 }
 0x81c   :  { %v2486_v14 = vrot.slane %v2427_v22, %v4935_v39  ;;  %v2509_v22 = vsel %vm429_vm3, %v2458_v29, %v2508_v15 }
 0x81d   :  { %v2510_v37 = vsel %vm431_vm4, %v2462_v16, %v2509_v22 }
 0x81e   :  { %v2412_v59 = vpop.permute.xlu0 %2411  ;;  %v2515_v4 = vsel %vm427_vm2, %v2486_v14, %v2514_v48 }
 0x81f   :  { %v2430_v6 = vpop.permute.xlu1 %2429  ;;  %v2466_v44 = vrot.slane %v2412_v59, %v4935_v39 }
 0x820   :  { %v2490_v61 = vrot.slane %v2430_v6, %v4935_v39 }
 0x821   :  { %v2511_v46 = vsel %vm433_vm5, %v2466_v44, %v2510_v37 }
 0x822   :  { %v2415_v9 = vpop.permute.xlu0 %2414  ;;  %v2516_v59 = vsel %vm429_vm3, %v2490_v61, %v2515_v4 }
 0x823   :  { %v2433_v35 = vpop.permute.xlu1 %2432  ;;  %v2470_v30 = vrot.slane %v2415_v9, %v4935_v39 }
 0x824   :  { %v2494_v8 = vrot.slane %v2433_v35, %v4935_v39 }
 0x825   :  { %v2512_v29 = vsel %vm435_vm6, %v2470_v30, %v2511_v46 }
 0x826   :  { %v2418_v6 = vpop.permute.xlu0 %2417  ;;  %v2517_v9 = vsel %vm431_vm4, %v2494_v8, %v2516_v59 }
 0x827   :  { %v2436_v42 = vpop.permute.xlu1 %2435  ;;  %v2474_v36 = vrot.slane %v2418_v6, %v4935_v39 }
 0x828   :  { %v2498_v21 = vrot.slane %v2436_v42, %v4935_v39 }
 0x829   :  { %v2513_v14 = vsel %vm437_vm7, %v2474_v36, %v2512_v29 }
 0x82a   :  { %v2518_v50 = vsel %vm433_vm5, %v2498_v21, %v2517_v9  ;;  %v2442_v20 = vpop.permute.xlu0 %2441  ;;  %v2523_v16 = vsel %vm448_vm8, %v2513_v14, 0.0 }
 0x82b   :  { %v2439_v35 = vpop.permute.xlu1 %2438  ;;  %v2506_v44 = vrot.slane %v2442_v20, %v4935_v39  ;;  %2524 = vadd.xlane.f32.xlu1 %v2523_v16 }
 0x82c   :  { %v2502_v62 = vrot.slane %v2439_v35, %v4935_v39 }
 0x82e   :  { %v2519_v61 = vsel %vm435_vm6, %v2502_v62, %v2518_v50 }
 0x82f   :  { %v2520_v42 = vsel %vm437_vm7, %v2506_v44, %v2519_v61  ;;  %v1987_v44 = vld [vmem:[%s4863_s4] sm:$0xff] }
 0x830   :  { %v2526_v15 = vsel %vm448_vm8, %v2520_v42, 0.0  ;;  %v1996_v42 = vld [vmem:[%s4863_s4 + $0x48] sm:$0xff] }
 0x831   :  { %2527 = vadd.xlane.f32.xlu0 %v2526_v15 }
 0x8b4   :  { %v2525_v8 = vpop.xlane.xlu1 %2524 }
 0x8b5   :  { %3153 = vrcp.f32 %v2525_v8 }
 0x8ba   :  { %v2528_v30 = vpop.xlane.xlu0 %2527 }
 0x8bb   :  { %3155 = vrcp.f32 %v2528_v30 }
 0x8c2   :  { %v3154_v48 = vpop.eup %3153 }
 0x8c3   :  { %v2544_v22 = vrot.slane %v3154_v48, %v4937_v33  ;;  %v2540_v21 = vrot.slane %v3154_v48, %v4936_v34  ;;  %v2536_v39 = vrot.slane %v3154_v48, %v3285_v17  ;;  %v2548_v9 = vrot.slane %v3154_v48, %v4938_v18 }
 0x8c4   :  { %v2552_v29 = vrot.slane %v3154_v48, %v4939_v41  ;;  %v2564_v14 = vrot.slane %v3154_v48, %v4942_v58 }
 0x8c5   :  { %v2615_v4 = vmul.f32 %v4599_v27, %v2544_v22  ;;  %v2614_v37 = vmul.f32 %v4590_v0, %v2540_v21  ;;  %v2613_v46 = vmul.f32 %v4585_v53, %v2536_v39  ;;  %v2616_v0 = vmul.f32 %v4613_v12, %v2548_v9 }
 0x8c6   :  { %v2617_v53 = vmul.f32 %v4619_v5, %v2552_v29 }
 0x8c7   :  { %2641 = vperm.xlu1 %3046, %v2615_v4   ;;  %2636 = vperm.xlu0 %3045, %v2614_v37   ;;  %v1997_v4 = vld [vmem:[%s4863_s4 + $0x50] sm:$0xff]  ;;  %v1990_v37 = vld [vmem:[%s4863_s4 + $0x18] sm:$0xff] }
 0x8c8   :  { %v3156_v6 = vpop.eup %3155 }
 0x8c9   :  { %v2572_v59 = vrot.slane %v3156_v6, %v4936_v34  ;;  %v2576_v35 = vrot.slane %v3156_v6, %v4937_v33  ;;  %v2568_v62 = vrot.slane %v3156_v6, %v3285_v17  ;;  %v2556_v33 = vrot.slane %v3154_v48, %v4940_v49 }
 0x8ca   :  { %v2560_v17 = vrot.slane %v3154_v48, %v4941_v28  ;;  %v2584_v50 = vrot.slane %v3156_v6, %v4939_v41  ;;  %v2596_v20 = vrot.slane %v3156_v6, %v4942_v58  ;;  %v2592_v41 = vrot.slane %v3156_v6, %v4941_v28  ;;  %v2855_v58 = vld [vmem:[%s4866_s7 + $0x10] sm:$0xff]  ;;  %v2854_v28 = vld [vmem:[%s4866_s7 + $0x8] sm:$0xff] }
 0x8cb   :  { %v2622_v36 = vmul.f32 %v4608_v2, %v2572_v59  ;;  %2631 = vperm.xlu0 %3045, %v2613_v46   ;;  %v2623_v27 = vmul.f32 %v4615_v60, %v2576_v35  ;;  %v2621_v34 = vmul.f32 %v4605_v63, %v2568_v62  ;;  %v2580_v2 = vrot.slane %v3156_v6, %v4938_v18 }
 0x8cc   :  { %v2618_v60 = vmul.f32 %v4625_v56, %v2556_v33  ;;  %v2619_v63 = vmul.f32 %v4631_v26, %v2560_v17  ;;  %v2625_v5 = vmul.f32 %v4627_v3, %v2584_v50  ;;  %v2588_v18 = vrot.slane %v3156_v6, %v4940_v49  ;;  %v2856_v49 = vld [vmem:[%s4866_s7 + $0x18] sm:$0xff]  ;;  %v1991_v33 = vld [vmem:[%s4863_s4 + $0x20] sm:$0xff] }
 0x8cd   :  { %2676 = vperm.xlu1 %3046, %v2622_v36   ;;  %v2624_v12 = vmul.f32 %v4621_v31, %v2580_v2  ;;  %v2620_v56 = vmul.f32 %v4637_v7, %v2564_v14  ;;  %v2628_v26 = vmul.f32 %v4643_v43, %v2596_v20  ;;  %v2627_v3 = vmul.f32 %v4639_v25, %v2592_v41  ;;  %v1989_v7 = vld [vmem:[%s4863_s4 + $0x10] sm:$0xff]  ;;  %v1988_v25 = vld [vmem:[%s4863_s4 + $0x8] sm:$0xff]  ;;  %v4731_v43 = vld [vmem:[%s4865_s6] sm:$0xff] }
 0x8ce   :  { %v2626_v31 = vmul.f32 %v4633_v19, %v2588_v18  ;;  %3029 = vmatprep.subr.mxu0 %v2856_v49  ;;  %v2853_v19 = vld [vmem:[%s4866_s7] sm:$0xff]  ;;  %v2005_v16 = vadd.f32 %v4731_v43, %v1989_v7  ;;  %v2004_v61 = vadd.f32 %v4731_v43, %v1988_v25  ;;  %v2003_v22 = vadd.f32 %v4731_v43, %v1987_v44 }
 0x8cf   :  { %2681 = vperm.xlu0 %3045, %v2623_v27   ;;  %3030 = vmatpush3.msra.mxu0 %v2856_v49  ;;  %v2012_v21 = vadd.f32 %v4731_v43, %v1996_v42  ;;  %v2006_v62 = vadd.f32 %v4731_v43, %v1990_v37  ;;  %v2007_v20 = vadd.f32 %v4731_v43, %v1991_v33 }
 0x8d0   :  { %3031 = vmatprep.subr.mxu0 %v2855_v58 }
 0x8d1   :  { %2646 = vperm.xlu1 %3046, %v2616_v0   ;;  %3032 = vmatpush3.msra.mxu0 %v2855_v58  ;;  %v2013_v0 = vadd.f32 %v4731_v43, %v1997_v4 }
 0x8d2   :  { %3033 = vmatprep.subr.mxu0 %v2854_v28 }
 0x8d3   :  { %2671 = vperm.xlu0 %3045, %v2621_v34   ;;  %3034 = vmatpush3.msra.mxu0 %v2854_v28 }
 0x8d4   :  { %3035 = vmatprep.subr.mxu0 %v2853_v19 }
 0x8d5   :  { %2651 = vperm.xlu1 %3046, %v2617_v53   ;;  %3036 = vmatpush3.msra.mxu0 %v2853_v19  ;;  %v1995_v53 = vld [vmem:[%s4863_s4 + $0x40] sm:$0xff] }
 0x8d7   :  { %2656 = vperm.xlu0 %3045, %v2618_v60  }
 0x8d9   :  { %2686 = vperm.xlu1 %3046, %v2624_v12  }
 0x8db   :  { %2661 = vperm.xlu0 %3045, %v2619_v63  }
 0x8dd   :  { %2691 = vperm.xlu1 %3046, %v2625_v5  }
 0x8df   :  { %2666 = vperm.xlu0 %3045, %v2620_v56  }
 0x8e1   :  { %2696 = vperm.xlu1 %3046, %v2626_v31   ;;  %v2011_v31 = vadd.f32 %v4731_v43, %v1995_v53 }
 0x8e3   :  { %2706 = vperm.xlu0 %3045, %v2628_v26  }
 0x8e5   :  { %2701 = vperm.xlu1 %3046, %v2627_v3  }
 0x942   :  { %v2642_v15 = vpop.permute.xlu1 %2641  ;;  %v2637_v8 = vpop.permute.xlu0 %2636 }
 0x943   :  { %v2711_v30 = vmul.f32 %v2642_v15, %v2005_v16  ;;  %v2710_v48 = vmul.f32 %v2637_v8, %v2004_v61 }
 0x945   :  { %v2739_v39 = vsel %vm294_vm0, %v2711_v30, 0.0  ;;  %v2732_v6 = vsel %vm294_vm0, %v2710_v48, 0.0  ;;  %v1992_v48 = vld [vmem:[%s4863_s4 + $0x28] sm:$0xff] }
 0x946   :  { %v2740_v59 = vrot.slane %v2739_v39, 4  ;;  %v2733_v46 = vrot.slane %v2732_v6, 4  ;;  %v2632_v36 = vpop.permute.xlu0 %2631 }
 0x947   :  { %v2709_v9 = vmul.f32 %v2632_v36, %v2003_v22  ;;  %v1998_v22 = vld [vmem:[%s4863_s4 + $0x58] sm:$0xff] }
 0x948   :  { %v2677_v35 = vpop.permute.xlu1 %2676  ;;  %v2741_v29 = vadd.f32 %v2740_v59, %v2739_v39  ;;  %v2734_v34 = vadd.f32 %v2733_v46, %v2732_v6  ;;  %v1993_v59 = vld [vmem:[%s4863_s4 + $0x30] sm:$0xff]  ;;  %v1999_v46 = vld [vmem:[%s4863_s4 + $0x60] sm:$0xff]  ;;  %v1994_v36 = vld [vmem:[%s4863_s4 + $0x38] sm:$0xff] }
 0x949   :  { %v2718_v27 = vmul.f32 %v2677_v35, %v2012_v21  ;;  %v2725_v2 = vsel %vm294_vm0, %v2709_v9, 0.0 }
 0x94a   :  { %v2742_v12 = vrot.slane %v2741_v29, 2  ;;  %v2735_v17 = vrot.slane %v2734_v34, 2  ;;  %v2726_v50 = vrot.slane %v2725_v2, 4  ;;  %v2682_v5 = vpop.permute.xlu0 %2681 }
 0x94b   :  { %v2788_v60 = vsel %vm294_vm0, %v2718_v27, 0.0  ;;  %v2719_v18 = vmul.f32 %v2682_v5, %v2013_v0  ;;  %v2008_v27 = vadd.f32 %v4731_v43, %v1992_v48  ;;  %v2010_v5 = vadd.f32 %v4731_v43, %v1994_v36 }
 0x94c   :  { %v2789_v63 = vrot.slane %v2788_v60, 4  ;;  %v2647_v14 = vpop.permute.xlu1 %2646  ;;  %v2743_v41 = vadd.f32 %v2742_v12, %v2741_v29  ;;  %v2736_v26 = vadd.f32 %v2735_v17, %v2734_v34  ;;  %v2727_v3 = vadd.f32 %v2726_v50, %v2725_v2  ;;  %v2002_v12 = vld [vmem:[%s4863_s4 + $0x78] sm:$0xff] }
 0x94d   :  { %v2712_v56 = vmul.f32 %v2647_v14, %v2006_v62  ;;  %v2795_v58 = vsel %vm294_vm0, %v2719_v18, 0.0  ;;  %v2014_v62 = vadd.f32 %v4731_v43, %v1998_v22  ;;  %v2009_v50 = vadd.f32 %v4731_v43, %v1993_v59 }
 0x94e   :  { %v2790_v49 = vadd.f32 %v2789_v63, %v2788_v60  ;;  %v2744_v19 = vrot.slane %v2743_v41, 1  ;;  %v2737_v7 = vrot.slane %v2736_v26, 1  ;;  %v2728_v25 = vrot.slane %v2727_v3, 2  ;;  %v2672_v61 = vpop.permute.xlu0 %2671  ;;  %v2000_v60 = vld [vmem:[%s4863_s4 + $0x68] sm:$0xff] }
 0x94f   :  { %v2746_v28 = vsel %vm294_vm0, %v2712_v56, 0.0  ;;  %v2796_v42 = vrot.slane %v2795_v58, 4  ;;  %v2717_v8 = vmul.f32 %v2672_v61, %v2011_v31  ;;  %v2015_v63 = vadd.f32 %v4731_v43, %v1999_v46 }
 0x950   :  { %v2791_v16 = vrot.slane %v2790_v49, 2  ;;  %v2652_v44 = vpop.permute.xlu1 %2651  ;;  %v2747_v15 = vrot.slane %v2746_v28, 4  ;;  %v2729_v21 = vadd.f32 %v2728_v25, %v2727_v3  ;;  %v2745_v35 = vadd.f32 %v2744_v19, %v2743_v41 }
 0x951   :  { %v2713_v30 = vmul.f32 %v2652_v44, %v2007_v20  ;;  %v2797_v4 = vadd.f32 %v2796_v42, %v2795_v58  ;;  %v2781_v39 = vsel %vm294_vm0, %v2717_v8, 0.0  ;;  %v2738_v9 = vadd.f32 %v2737_v7, %v2736_v26  ;;  %v2001_v20 = vld [vmem:[%s4863_s4 + $0x70] sm:$0xff]  ;;  %s3195_s4 = smov [#allocation2]  }
 0x952   :  { %v2748_v37 = vadd.f32 %v2747_v15, %v2746_v28  ;;  %v2657_v0 = vpop.permute.xlu0 %2656  ;;  %v2792_v34 = vadd.f32 %v2791_v16, %v2790_v49  ;;  %v2782_v33 = vrot.slane %v2781_v39, 4  ;;  %v2730_v17 = vrot.slane %v2729_v21, 1  ;;  %s3010_s11 = sshll.u32 %s3195_s4, 4  ;;  %s3011_s11 = int_to_ptr.vmem [resolvable:$true] %s3010_s11 }
 0x953   :  { %v2753_v6 = vsel %vm294_vm0, %v2713_v30, 0.0  ;;  %v2798_v53 = vrot.slane %v2797_v4, 2  ;;  %v2714_v41 = vmul.f32 %v2657_v0, %v2008_v27  ;;  %v2016_v58 = vadd.f32 %v4731_v43, %v2000_v60  ;;  %s3171_s7 = scalar_lea.vmem %s3011_s11, 256  ;;  %p3176_p1 = scmp.lt.s32.totalorder %s3011_s11, %s3011_s11 }
 0x954   :  { %v2687_v29 = vpop.permute.xlu1 %2686  ;;  %v2754_v2 = vrot.slane %v2753_v6, 4  ;;  %v2749_v18 = vrot.slane %v2748_v37, 2  ;;  %v2783_v56 = vadd.f32 %v2782_v33, %v2781_v39  ;;  %v2018_v28 = vadd.f32 %v4731_v43, %v2002_v12  ;;  %p3172_p0 = scmp.ne.s32.totalorder %s3011_s11, %s3171_s7  ;;  %p3177_p2 = scmp.lt.s32.totalorder %s3171_s7, %s3171_s7 }
 0x955   :  { %v2799_v14 = vadd.f32 %v2798_v53, %v2797_v4  ;;  %v2720_v26 = vmul.f32 %v2687_v29, %v2014_v62  ;;  %v4799_v19 = vadd.f32 %v2745_v35, %v4377_v45  ;;  %v4802_v7 = vadd.f32 %v2738_v9, %v4350_v38 }
 0x956   :  { %v2755_v31 = vadd.f32 %v2754_v2, %v2753_v6  ;;  %v2662_v3 = vpop.permute.xlu0 %2661  ;;  %v2793_v25 = vrot.slane %v2792_v34, 1  ;;  %v2760_v61 = vsel %vm294_vm0, %v2714_v41, 0.0  ;;  %v2017_v15 = vadd.f32 %v4731_v43, %v2001_v20  ;;  %p3178_p3 = por %p3177_p2, %p3176_p1 }
 0x957   :  { %v2802_v44 = vsel %vm294_vm0, %v2720_v26, 0.0  ;;  %v2715_v42 = vmul.f32 %v2662_v3, %v2009_v50  ;;  %v2731_v8 = vadd.f32 %v2730_v17, %v2729_v21  ;;  %v2800_v30 = vrot.slane %v2799_v14, 1 }
 0x958   :  { %v2692_v49 = vpop.permute.xlu1 %2691  ;;  %v2756_v16 = vrot.slane %v2755_v31, 2  ;;  %v2750_v48 = vadd.f32 %v2749_v18, %v2748_v37  ;;  %v2784_v22 = vrot.slane %v2783_v56, 2  ;;  %v2761_v4 = vrot.slane %v2760_v61, 4  ;;  %p3179_p4 = pnand %p3178_p3, %p3172_p0 }
 0x959   :  { %v2803_v39 = vrot.slane %v2802_v44, 4  ;;  %v2767_v45 = vsel %vm294_vm0, %v2715_v42, 0.0  ;;  %v2721_v6 = vmul.f32 %v2692_v49, %v2015_v63  ;;  %v2875_v46 = vrot.slane %v4799_v19, 6 }
 0x95a   :  { %v2667_v38 = vpop.permute.xlu0 %2666  ;;  %v2873_v36 = vrot.slane %v4802_v7, 7  ;;  %v2794_v35 = vadd.f32 %v2793_v25, %v2792_v34  ;;  %v2757_v9 = vadd.f32 %v2756_v16, %v2755_v31  ;;  %v2762_v27 = vadd.f32 %v2761_v4, %v2760_v61 }
 0x95b   :  { %v2804_v0 = vadd.f32 %v2803_v39, %v2802_v44  ;;  %v2768_v43 = vrot.slane %v2767_v45, 4  ;;  %v2809_v21 = vsel %vm294_vm0, %v2721_v6, 0.0  ;;  %v2837_v37 = vadd.f32 %v2731_v8, %v4353_v52 }
 0x95c   :  { %v2697_v59 = vpop.permute.xlu1 %2696  ;;  %v2801_v62 = vadd.f32 %v2800_v30, %v2799_v14  ;;  %v2751_v29 = vrot.slane %v2750_v48, 1  ;;  %v2785_v53 = vadd.f32 %v2784_v22, %v2783_v56  ;;  %v2763_v33 = vrot.slane %v2762_v27, 2 }
 0x95d   :  { %v2805_v2 = vrot.slane %v2804_v0, 2  ;;  %v2769_v60 = vadd.f32 %v2768_v43, %v2767_v45  ;;  %v2810_v12 = vrot.slane %v2809_v21, 4  ;;  %v4813_v17 = vadd.f32 %v2794_v35, %v4395_v57 }
 0x95e   :  { %v2758_v50 = vrot.slane %v2757_v9, 1  ;;  %v2716_v34 = vmul.f32 %v2667_v38, %v2010_v5  ;;  %v2722_v63 = vmul.f32 %v2697_v59, %v2016_v58  ;;  %v2764_v18 = vadd.f32 %v2763_v33, %v2762_v27  ;;  %v2707_v26 = vpop.permute.xlu0 %2706 }
 0x95f   :  { %v2806_v31 = vadd.f32 %v2805_v2, %v2804_v0  ;;  %v2770_v20 = vrot.slane %v2769_v60, 2  ;;  %v2811_v41 = vadd.f32 %v2810_v12, %v2809_v21  ;;  %v4816_v52 = vadd.f32 %v2801_v62, %v4409_v54 }
 0x960   :  { %v2702_v3 = vpop.permute.xlu1 %2701  ;;  %v2752_v14 = vadd.f32 %v2751_v29, %v2750_v48  ;;  %v2774_v56 = vsel %vm294_vm0, %v2716_v34, 0.0  ;;  %v2816_v49 = vsel %vm294_vm0, %v2722_v63, 0.0  ;;  %v2786_v25 = vrot.slane %v2785_v53, 1 }
 0x961   :  { %v2765_v57 = vrot.slane %v2764_v18, 1  ;;  %v2771_v16 = vadd.f32 %v2770_v20, %v2769_v60  ;;  %v2812_v61 = vrot.slane %v2811_v41, 2  ;;  %v2775_v5 = vrot.slane %v2774_v56, 4 }
 0x962   :  { %v2817_v58 = vrot.slane %v2816_v49, 4  ;;  %v2724_v44 = vmul.f32 %v2707_v26, %v2018_v28  ;;  %v2723_v42 = vmul.f32 %v2702_v3, %v2017_v15  ;;  %v2759_v8 = vadd.f32 %v2758_v50, %v2757_v9 }
 0x963   :  { %v2807_v30 = vrot.slane %v2806_v31, 1  ;;  %v2772_v22 = vrot.slane %v2771_v16, 1  ;;  %v2813_v4 = vadd.f32 %v2812_v61, %v2811_v41  ;;  %v2776_v39 = vadd.f32 %v2775_v5, %v2774_v56 }
 0x964   :  { %v2818_v54 = vadd.f32 %v2817_v58, %v2816_v49  ;;  %v2830_v48 = vsel %vm294_vm0, %v2724_v44, 0.0  ;;  %v2823_v45 = vsel %vm294_vm0, %v2723_v42, 0.0  ;;  %v2840_v6 = vadd.f32 %v2752_v14, %v4400_v1 }
 0x965   :  { %v2766_v38 = vadd.f32 %v2765_v57, %v2764_v18  ;;  %v2773_v59 = vadd.f32 %v2772_v22, %v2771_v16  ;;  %v2814_v35 = vrot.slane %v2813_v4, 1  ;;  %v2777_v27 = vrot.slane %v2776_v39, 2 }
 0x966   :  { %v2819_v0 = vrot.slane %v2818_v54, 2  ;;  %v2831_v43 = vrot.slane %v2830_v48, 4  ;;  %v2824_v28 = vrot.slane %v2823_v45, 4  ;;  %v2787_v15 = vadd.f32 %v2786_v25, %v2785_v53 }
 0x967   :  { %v2841_v9 = vadd.f32 %v2759_v8, %v4414_v47  ;;  %v2808_v21 = vadd.f32 %v2807_v30, %v2806_v31  ;;  %v2815_v62 = vadd.f32 %v2814_v35, %v2813_v4  ;;  %v2778_v29 = vadd.f32 %v2777_v27, %v2776_v39 }
 0x968   :  { %v2820_v33 = vadd.f32 %v2819_v0, %v2818_v54  ;;  %v2832_v2 = vadd.f32 %v2831_v43, %v2830_v48  ;;  %v2825_v60 = vadd.f32 %v2824_v28, %v2823_v45  ;;  %v2877_v12 = vrot.slane %v2840_v6, 5 }
 0x969   :  { %v2842_v50 = vadd.f32 %v2766_v38, %v4430_v55  ;;  %v2843_v1 = vadd.f32 %v2773_v59, %v4442_v32  ;;  %v2874_v34 = vsel %vm425_vm1, %v2873_v36, %v2837_v37  ;;  %v2779_v63 = vrot.slane %v2778_v29, 1 }
 0x96a   :  { %v2821_v18 = vrot.slane %v2820_v33, 1  ;;  %v2833_v53 = vrot.slane %v2832_v2, 2  ;;  %v2826_v20 = vrot.slane %v2825_v60, 2  ;;  %v2845_v47 = vadd.f32 %v2787_v15, %v4382_v40 }
 0x96b   :  { %v2879_v31 = vrot.slane %v2841_v9, 4  ;;  %v2848_v41 = vadd.f32 %v2808_v21, %v4426_v24  ;;  %v2849_v26 = vadd.f32 %v2815_v62, %v4434_v23  ;;  %v2780_v56 = vadd.f32 %v2779_v63, %v2778_v29 }
 0x96c   :  { %v2822_v3 = vadd.f32 %v2821_v18, %v2820_v33  ;;  %v2834_v14 = vadd.f32 %v2833_v53, %v2832_v2  ;;  %v2827_v55 = vadd.f32 %v2826_v20, %v2825_v60  ;;  %v2887_v32 = vrot.slane %v4813_v17, 7 }
 0x96d   :  { %v2876_v7 = vsel %vm427_vm2, %v2875_v46, %v2874_v34  ;;  %v2881_v36 = vrot.slane %v2842_v50, 3  ;;  %v2883_v37 = vrot.slane %v2843_v1, 2  ;;  %v2844_v24 = vadd.f32 %v2780_v56, %v4455_v10 }
 0x96e   :  { %v2850_v49 = vadd.f32 %v2822_v3, %v4448_v13  ;;  %v2835_v40 = vrot.slane %v2834_v14, 1  ;;  %v2828_v25 = vrot.slane %v2827_v55, 1  ;;  %v2889_v23 = vrot.slane %v4816_v52, 6 }
 0x96f   :  { %v2888_v57 = vsel %vm425_vm1, %v2887_v32, %v2845_v47  ;;  %v2891_v16 = vrot.slane %v2848_v41, 5  ;;  %v2878_v61 = vsel %vm429_vm3, %v2877_v12, %v2876_v7  ;;  %v2893_v17 = vrot.slane %v2849_v26, 4 }
 0x970   :  { %v2836_v5 = vadd.f32 %v2835_v40, %v2834_v14  ;;  %v2829_v19 = vadd.f32 %v2828_v25, %v2827_v55  ;;  %v2880_v46 = vsel %vm431_vm4, %v2879_v31, %v2878_v61  ;;  %v2895_v58 = vrot.slane %v2850_v49, 3 }
 0x971   :  { %v2882_v44 = vsel %vm433_vm5, %v2881_v36, %v2880_v46  ;;  %v2885_v13 = vrot.slane %v2844_v24, 1  ;;  %v2890_v8 = vsel %vm427_vm2, %v2889_v23, %v2888_v57 }
 0x972   :  { %v2851_v42 = vadd.f32 %v2829_v19, %v4461_v11  ;;  %v2884_v10 = vsel %vm435_vm6, %v2883_v37, %v2882_v44  ;;  %v2852_v52 = vadd.f32 %v2836_v5, %v4464_v51  ;;  %v2892_v22 = vsel %vm429_vm3, %v2891_v16, %v2890_v8  ;;  %v4943_v51 = vld [vmem:[#allocation5_spill] sm:$0xff] }
 0x973   :  { %v2886_v30 = vsel %vm437_vm7, %v2885_v13, %v2884_v10  ;;  %v2894_v39 = vsel %vm431_vm4, %v2893_v17, %v2892_v22  ;;  %vm2980_vm9 = vcmp.lt.s32.totalorder %v4943_v51, 24 }
 0x974   :  { %v2897_v4 = vrot.slane %v2851_v42, 2  ;;  %3037 = vmatprep.mubr.msk.f32.mxu0 %vm294_vm0, %v2886_v30  ;;  %v2896_v54 = vsel %vm433_vm5, %v2895_v58, %v2894_v39  ;;  %v2899_v48 = vrot.slane %v2852_v52, 1 }
 0x976   :  { %v2898_v11 = vsel %vm435_vm6, %v2897_v4, %v2896_v54 }
 0x977   :  { %v2900_v45 = vsel %vm437_vm7, %v2899_v48, %v2898_v11 }
 0x978   :  { %3038 = vmatmul.mubr.msk.f32.vlgmr.msra.gmra.mxu0 %vm294_vm0, %v2900_v45 }
 0xa38   :  { %v3039_v6 = vpop.f32.mrf.mxu0 }
 0xa39   :  { %v2982_v38 = vsel %vm2980_vm9, %v3039_v6, -1e+30 }
 0xa3a   :  { %2985 = vmax.xlane.f32.xlu0 %v2982_v38  ;;  %v2971_v59 = vpop.f32.mrf.mxu0 }
 0xa3b   :  { %v2981_v35 = vsel %vm2980_vm9, %v2971_v59, -1e+30 }
 0xa3c   :  { %2983 = vmax.xlane.f32.xlu1 %v2981_v35 }
 0xac3   :  { %v2986_v27 = vpop.xlane.xlu0 %2985 }
 0xac4   :  { %v2988_v0 = vsub.f32 %v2982_v38, %v2986_v27 }
 0xac5   :  { %v2984_v43 = vpop.xlane.xlu1 %2983 }
 0xac6   :  { %v2991_v28 = vmul.f32 1.442695, %v2988_v0  ;;  %v2987_v15 = vsub.f32 %v2981_v35, %v2984_v43 }
 0xac8   :  { %3157 = vpow2.f32 %v2991_v28  ;;  %v2989_v9 = vmul.f32 1.442695, %v2987_v15 }
 0xaca   :  { %3159 = vpow2.f32 %v2989_v9 }
 0xad5   :  { %v3158_v21 = vpop.eup %3157 }
 0xad6   :  { %2995 = vadd.xlane.f32.xlu1 %v3158_v21 }
 0xad7   :  { %v3160_v62 = vpop.eup %3159 }
 0xad8   :  { %2993 = vadd.xlane.f32.xlu0 %v3160_v62 }
 0xb5f   :  { %v2996_v29 = vpop.xlane.xlu1 %2995 }
 0xb60   :  { %3161 = vlog2.f32 %v2996_v29 }
 0xb61   :  { %v2994_v33 = vpop.xlane.xlu0 %2993 }
 0xb62   :  { %3163 = vlog2.f32 %v2994_v33 }
 0xb6d   :  { %v3162_v2 = vpop.eup %3161 }
 0xb6e   :  { %v3000_v60 = vmul.f32 0.6931472, %v3162_v2 }
 0xb6f   :  { %v3164_v12 = vpop.eup %3163 }
 0xb70   :  { %v3002_v50 = vsub.f32 %v2988_v0, %v3000_v60  ;;  %v2998_v1 = vmul.f32 0.6931472, %v3164_v12 }
 0xb72   :  { %3004 = vst [vmem:[#allocation2 + $0x8] sm:$0xff] %v3002_v50  ;;  %v3001_v34 = vsub.f32 %v2987_v15, %v2998_v1 }
 0xb74   :  { %3003 = vst [vmem:[#allocation2] sm:$0xff] %v3001_v34 }
 0xb75   :  { %3182 = shalt.err (!%p3179_p4)
}
 0xb76   :  { %s3196_s0 = smov 128   ;;  %s3197_s12 = smov 8  }
 0xb77   :  { %3016 = dma.vmem_to_hbm [thread:$0]  %s3011_s11, 256, %s4867_s8, [#allocation3], %s3196_s0, %s3196_s0, %s3197_s12  }
 0xb78   :  { %3191 = dma.done.wait [#allocation3], 256  }
 0xb79   :  { %3192 = vsyncadd [#allocation3], 4294967040 }
 0xb7a   :  { %3020 = vsyncpa [#allocation3], 1 }

</bundles_post_ra>
